<compile_context>
chip_gen: v7x
topology: tpu7x:2x2x1
jax: 0.10.0
libtpu: 0.0.40
codegen_flags: <defaults>
</compile_context>

<pallas_src>
import math

import jax
import jax.numpy as jnp
import numpy as np
from jax.experimental import pallas as pl
from jax.experimental.pallas import tpu as pltpu

_EPS = 1e-7
_RHO_PAD = -30.0   # softplus(-30) underflows to exactly 0.0 in f32 -> the KL of a
                   # padded element is exactly -log(_EPS), corrected in the wrapper.


def _softplus(v, beta=1.0, threshold=20.0):
    """Overflow-safe softplus matching torch.nn.Softplus(beta, threshold=20)."""
    bv = beta * v
    sp = jnp.log(1.0 + jnp.exp(jnp.minimum(bv, threshold))) / beta
    return jnp.where(bv > threshold, v, sp)


def _round_up(v, m):
    return ((int(v) + m - 1) // m) * m


# -----------------------------------------------------------------------------
# Generation-aware VMEM budgeting / tile selection
# -----------------------------------------------------------------------------
def _vmem_caps():
    """Returns (tiling_budget_bytes, vmem_limit_bytes) from the chip's VMEM."""
    cap = None
    try:
        info = pltpu.get_tpu_info()
        cap = int(getattr(info, "vmem_capacity_bytes", 0)) or None
    except Exception:
        cap = None
    if cap is None:
        cap = 64 * 1024 * 1024               # conservative (v7x per-TC size)
    budget = min(cap // 2, 48 * 1024 * 1024)  # v5e/v6e: 48 MiB, v7x: 32 MiB
    limit = min(budget + 8 * 1024 * 1024, cap - 2 * 1024 * 1024)
    return budget, max(limit, budget)


def _max_block_rows(budget, *, B, H, n_buf, x_itemsize, w_itemsize,
                    rho_itemsize, stream_rho1, training, kl1_in_kernel):
    """Max G-rows per tile s.t. pipeline buffers + residents fit `budget`."""
    resident = B * H * 4                          # mean1 accumulator
    if training:
        resident += B * H * 4                     # var1 accumulator
        resident += 2 * (B * H + H + B) * 4       # eps1 / unif / eps2 buffers
    if kl1_in_kernel:
        resident += 8 * H * 4                     # vreg-shaped KL partial
    resident += 2 * 8 * H * 4                     # small (1,H)/(1,1) params
    resident += 2 * B * H * 4 + B * 4             # finalize temporaries / outputs
    resident += 512 * 1024                        # compiler scratch headroom

    per_row = n_buf * (B * x_itemsize + H * w_itemsize
                       + (H * rho_itemsize if stream_rho1 else 0))
    if stream_rho1:
        per_row += 2 * H * 4                      # softplus(rho) / KL-term temps
    if training:
        per_row += B * x_itemsize                 # x*x temporary

    avail = budget - resident
    if avail <= per_row * 128:
        return 128
    return avail // per_row


def _auto_block_g(G, max_rows):
    if G <= max_rows:
        return _round_up(G, 8)                    # single tile
    max_tg = max(128, (max_rows // 128) * 128)
    for tg in range(max_tg, 127, -128):           # prefer exact divisors (no pad)
        if G % tg == 0:
            return tg
    return max_tg                                 # pad the last tile


# -----------------------------------------------------------------------------
# Kernel factory
# -----------------------------------------------------------------------------
def _make_predictor_kernel(*, sigma, p_prior, training, compute_kl,
                           stream_rho1, kl1_in_kernel, need_small_rho,
                           compute_dtype):
    log_sigma = math.log(sigma)
    inv_two_sigma2 = 1.0 / (2.0 * sigma * sigma)
    log_p_prior = math.log(p_prior + _EPS)
    log_1m_p_prior = math.log(1.0 - p_prior + _EPS)

    def gauss_kl(sb, mb):
        # full KL (constants included) -- only used on the tiny parameters
        return jnp.sum((sb * sb + mb * mb) * inv_two_sigma2
                       - jnp.log(sb + _EPS) + (log_sigma - 0.5))

    def kernel(*refs):
        it = iter(refs)
        x_ref = next(it)                                   # (B, tG)
        mu_b1_ref = next(it)                               # (tG, H)
        rho_b1_ref = next(it) if stream_rho1 else None     # (tG, H)
        mu_bias1_ref = next(it)                            # (1, H)
        rho_bias1_ref = next(it) if need_small_rho else None
        mu_b2_ref = next(it)                               # (1, H) == mu_beta2^T
        rho_b2_ref = next(it) if need_small_rho else None
        mu_bias2_ref = next(it)                            # (1, 1)
        rho_bias2_ref = next(it) if need_small_rho else None
        plogit_ref = next(it)                              # (1, H)
        eps1_ref = next(it) if training else None          # (B, H)
        unif_ref = next(it) if training else None          # (1, H)
        eps2_ref = next(it) if training else None          # (B, 1)
        out_ref = next(it)                                 # (B, 1)
        kl_ref = next(it)                                  # (1, 1)
        mean1_acc = next(it)                               # VMEM (B, H) f32
        var1_acc = next(it) if training else None          # VMEM (B, H) f32
        kl_acc = next(it) if kl1_in_kernel else None       # VMEM (8, H) f32

        g = pl.program_id(0)
        last_g = pl.num_programs(0) - 1

        @pl.when(g == 0)
        def _init():
            mean1_acc[...] = jnp.zeros_like(mean1_acc)
            if training:
                var1_acc[...] = jnp.zeros_like(var1_acc)
            if kl1_in_kernel:
                kl_acc[...] = jnp.zeros_like(kl_acc)

        # ----- layer-1 partial products for this G tile (pipelined) -----
        x = x_ref[...]                       # already in compute dtype
        mu_b1 = mu_b1_ref[...]
        mean1_acc[...] += jnp.dot(x, mu_b1, preferred_element_type=jnp.float32)

        if stream_rho1:
            sigma_b1 = _softplus(rho_b1_ref[...].astype(jnp.float32))
        if training:
            var1_acc[...] += jnp.dot(
                x * x, (sigma_b1 * sigma_b1).astype(compute_dtype),
                preferred_element_type=jnp.float32)
        if kl1_in_kernel:
            # elementwise KL terms (constant log(sigma)-0.5 added in the wrapper)
            mu_f32 = mu_b1.astype(jnp.float32)
            terms = ((sigma_b1 * sigma_b1 + mu_f32 * mu_f32) * inv_two_sigma2
                     - jnp.log(sigma_b1 + _EPS))
            # vreg-shaped partial: (tG,H) -> (tG/8, 8, H) sum over the leading
            # axis is pure VPU adds; no per-step cross-lane reduce.
            tg, h = terms.shape
            kl_acc[...] += jnp.sum(terms.reshape(tg // 8, 8, h), axis=0)

        # ----- finalize on the last G tile -----
        @pl.when(g == last_g)
        def _finalize():
            mu_bias1 = mu_bias1_ref[...].astype(jnp.float32)   # (1, H)
            mu_b2 = mu_b2_ref[...].astype(jnp.float32)         # (1, H)
            mu_bias2 = mu_bias2_ref[...].astype(jnp.float32)   # (1, 1)
            p = 1.0 / (1.0 + jnp.exp(-plogit_ref[...].astype(jnp.float32)))

            if need_small_rho:
                sigma_bias1 = _softplus(rho_bias1_ref[...].astype(jnp.float32))
                sigma_b2 = _softplus(rho_b2_ref[...].astype(jnp.float32))
                sigma_bias2 = _softplus(rho_bias2_ref[...].astype(jnp.float32))

            mean1 = mean1_acc[...] + mu_bias1
            if training:
                var1 = var1_acc[...] + sigma_bias1 * sigma_bias1
                h1 = mean1 + jnp.sqrt(var1) * eps1_ref[...]
            else:
                h1 = mean1
            x1 = _softplus(h1, beta=10.0)                      # (B, H)

            # Layer 2: out_dim == 1 -> VPU multiply + lane reduction (no
            # 1/128-lane-utilized MXU matmul).
            if training:
                temp, ll, lr = 0.1, -0.1, 1.1
                u = unif_ref[...]
                s = (jnp.log(p + _EPS) - jnp.log(1.0 - p + _EPS)
                     + jnp.log(u + _EPS) - jnp.log(1.0 - u + _EPS))
                s = 1.0 / (1.0 + jnp.exp(-s / temp))
                s_bar = s * (lr - ll) + ll
                keep = jnp.minimum(1.0, jnp.maximum(0.0, s_bar))
                x2 = x1 * keep
                mean2 = jnp.sum(x2 * mu_b2, axis=-1, keepdims=True) + mu_bias2
                var2 = (jnp.sum((x2 * x2) * (sigma_b2 * sigma_b2),
                                axis=-1, keepdims=True)
                        + sigma_bias2 * sigma_bias2)
                out = mean2 + jnp.sqrt(var2) * eps2_ref[...]
            else:
                out = jnp.sum(x1 * (p * mu_b2), axis=-1, keepdims=True) + mu_bias2

            out_ref[...] = out.astype(out_ref.dtype)

            if compute_kl:
                kl_small = (gauss_kl(sigma_bias1, mu_bias1)
                            + gauss_kl(sigma_b2, mu_b2)
                            + gauss_kl(sigma_bias2, mu_bias2)
                            + jnp.sum(p * jnp.log(p + _EPS)
                                      + (1.0 - p) * jnp.log(1.0 - p + _EPS))
                            - jnp.sum(p * log_p_prior
                                      + (1.0 - p) * log_1m_p_prior))
                if kl1_in_kernel:
                    kl_ref[...] = jnp.sum(kl_acc[...], keepdims=True) + kl_small
                else:
                    kl_ref[...] = jnp.zeros_like(kl_ref) + kl_small
            else:
                kl_ref[...] = jnp.zeros_like(kl_ref)

    return kernel


# -----------------------------------------------------------------------------
# Wrapper
# -----------------------------------------------------------------------------
def compute_kl_beta1(params, sigma=0.5):
    """x-independent layer-1 weight KL. Compute once per parameter update and
    pass as `cached_kl_beta1` so eval forwards never stream rho_beta1."""
    sb = _softplus(jnp.asarray(params["rho_beta1"], jnp.float32))
    mb = jnp.asarray(params["mu_beta1"], jnp.float32)
    return jnp.sum((sb * sb + mb * mb) / (2.0 * sigma * sigma)
                   - jnp.log(sb + _EPS) + (math.log(sigma) - 0.5))


def predictor_wide(x, params, *, sigma=0.5, p_prior=0.1, training=False,
                   compute_kl=True, eps1=None, unif=None, eps2=None,
                   weight_dtype=None, rho_dtype=None, block_g=None,
                   cached_kl_beta1=None):
    B, G = x.shape
    H = params["mu_beta1"].shape[1]
    f32 = jnp.float32

    w_dtype = f32 if weight_dtype is None else jnp.dtype(weight_dtype)
    r_dtype = w_dtype if rho_dtype is None else jnp.dtype(rho_dtype)
    compute_dtype = w_dtype

    use_cached_kl1 = compute_kl and (cached_kl_beta1 is not None)
    stream_rho1 = training or (compute_kl and not use_cached_kl1)
    kl1_in_kernel = compute_kl and not use_cached_kl1
    need_small_rho = training or compute_kl
    # mu-only eval stream: deepen the input pipeline to hide exposed DMA.
    n_buf = 3 if (not training and not stream_rho1) else 2

    x = jnp.asarray(x, compute_dtype)     # cast once here, not per grid step

    if training:
        # TODO(synk): the torch module samples eps/unif with torch.randn/rand
        # inside forward(); here the noise is taken as explicit inputs.
        if eps1 is None or unif is None or eps2 is None:
            raise ValueError("training=True requires eps1, unif and eps2")
        eps1 = jnp.asarray(eps1, f32).reshape(B, H)
        unif = jnp.asarray(unif, f32).reshape(1, H)
        eps2 = jnp.asarray(eps2, f32).reshape(B, 1)

    budget, vmem_limit = _vmem_caps()
    if block_g is None:
        max_rows = _max_block_rows(
            budget, B=B, H=H, n_buf=n_buf,
            x_itemsize=jnp.dtype(compute_dtype).itemsize,
            w_itemsize=jnp.dtype(w_dtype).itemsize,
            rho_itemsize=jnp.dtype(r_dtype).itemsize,
            stream_rho1=stream_rho1, training=training,
            kl1_in_kernel=kl1_in_kernel)
        block_g = _auto_block_g(G, max_rows)
    else:
        block_g = int(block_g)
        if block_g < G:                               # multi-tile: (8,128) rule
            block_g = max(128, _round_up(block_g, 128))
        else:
            block_g = _round_up(block_g, 8)
    block_g = _round_up(max(block_g, 8), 8)

    G_pad = _round_up(G, block_g)
    n_pad = G_pad - G
    n_g = G_pad // block_g

    mu_b1 = jnp.asarray(params["mu_beta1"], w_dtype)
    rho_b1 = jnp.asarray(params["rho_beta1"], r_dtype) if stream_rho1 else None
    if n_pad:
        # TODO(synk): in a production model pre-pad the (G,H) parameters once
        # per update instead of per forward call.
        x = jnp.pad(x, ((0, 0), (0, n_pad)))
        mu_b1 = jnp.pad(mu_b1, ((0, n_pad), (0, 0)))
        if stream_rho1:
            rho_b1 = jnp.pad(rho_b1, ((0, n_pad), (0, 0)),
                             constant_values=_RHO_PAD)

    stream_kwargs = ({"pipeline_mode": pl.Buffered(buffer_count=n_buf)}
                     if n_buf != 2 else {})
    x_spec = pl.BlockSpec((B, block_g), lambda g: (0, g), **stream_kwargs)
    w1_spec = pl.BlockSpec((block_g, H), lambda g: (g, 0), **stream_kwargs)
    row_h_spec = pl.BlockSpec((1, H), lambda g: (0, 0))
    one_spec = pl.BlockSpec((1, 1), lambda g: (0, 0))
    bh_spec = pl.BlockSpec((B, H), lambda g: (0, 0))
    b1_spec = pl.BlockSpec((B, 1), lambda g: (0, 0))

    inputs, in_specs = [], []

    def add(arr, spec):
        inputs.append(arr)
        in_specs.append(spec)

    add(x, x_spec)
    add(mu_b1, w1_spec)
    if stream_rho1:
        add(rho_b1, w1_spec)
    add(jnp.asarray(params["mu_bias1"], f32).reshape(1, H), row_h_spec)
    if need_small_rho:
        add(jnp.asarray(params["rho_bias1"], f32).reshape(1, H), row_h_spec)
    add(jnp.asarray(params["mu_beta2"], f32).reshape(1, H), row_h_spec)
    if need_small_rho:
        add(jnp.asarray(params["rho_beta2"], f32).reshape(1, H), row_h_spec)
    add(jnp.asarray(params["mu_bias2"], f32).reshape(1, 1), one_spec)
    if need_small_rho:
        add(jnp.asarray(params["rho_bias2"], f32).reshape(1, 1), one_spec)
    add(jnp.asarray(params["p_logit"], f32).reshape(1, H), row_h_spec)
    if training:
        add(eps1, bh_spec)
        add(unif, row_h_spec)
        add(eps2, b1_spec)

    scratch_shapes = [pltpu.VMEM((B, H), jnp.float32)]          # mean1 acc
    if training:
        scratch_shapes.append(pltpu.VMEM((B, H), jnp.float32))  # var1 acc
    if kl1_in_kernel:
        scratch_shapes.append(pltpu.VMEM((8, H), jnp.float32))  # KL(beta1) partial

    out_shape = (jax.ShapeDtypeStruct((B, 1), jnp.float32),
                 jax.ShapeDtypeStruct((1, 1), jnp.float32))
    out_specs = (pl.BlockSpec((B, 1), lambda g: (0, 0)),
                 pl.BlockSpec((1, 1), lambda g: (0, 0)))

    kernel = _make_predictor_kernel(
        sigma=float(sigma), p_prior=float(p_prior), training=training,
        compute_kl=compute_kl, stream_rho1=stream_rho1,
        kl1_in_kernel=kl1_in_kernel, need_small_rho=need_small_rho,
        compute_dtype=compute_dtype)

    out, kl_raw = pl.pallas_call(
        kernel,
        out_shape=out_shape,
        grid_spec=pltpu.PrefetchScalarGridSpec(
            num_scalar_prefetch=0,
            grid=(n_g,),
            in_specs=in_specs,
            out_specs=out_specs,
            scratch_shapes=scratch_shapes),
        compiler_params=pltpu.CompilerParams(
            dimension_semantics=("arbitrary",),
            vmem_limit_bytes=int(vmem_limit)),
    )(*inputs)

    kl = kl_raw[0, 0]
    if compute_kl:
        if kl1_in_kernel:
            # per-element constant for the G*H real elements + exact removal of
            # the padded rows' contribution (-log(_EPS) each, since sigma==0).
            const = G * H * (math.log(sigma) - 0.5) + n_pad * H * math.log(_EPS)
            kl = kl + jnp.float32(const)
        else:
            kl = kl + jnp.asarray(cached_kl_beta1, f32)
    return out, kl


# -----------------------------------------------------------------------------
# Pure-JAX reference (eval and training) for correctness checks
# -----------------------------------------------------------------------------
def _reference_forward(x, params, *, sigma=0.5, p_prior=0.1, training=False,
                       eps1=None, unif=None, eps2=None):
    eps = 1e-7
    sb1 = _softplus(params["rho_beta1"])
    sbi1 = _softplus(params["rho_bias1"])
    sb2 = _softplus(params["rho_beta2"])
    sbi2 = _softplus(params["rho_bias2"])
    p = jax.nn.sigmoid(params["p_logit"])

    mean1 = x @ params["mu_beta1"] + params["mu_bias1"]
    if training:
        var1 = (x ** 2) @ (sb1 ** 2) + sbi1 ** 2
        h1 = mean1 + jnp.sqrt(var1) * eps1
    else:
        h1 = mean1
    x1 = _softplus(h1, beta=10.0)

    if training:
        temp, ll, lr = 0.1, -0.1, 1.1
        s = (jnp.log(p + eps) - jnp.log(1 - p + eps)
             + jnp.log(unif + eps) - jnp.log(1 - unif + eps))
        s = jax.nn.sigmoid(s / temp)
        keep = jnp.clip(s * (lr - ll) + ll, 0.0, 1.0)
        x2 = x1 * keep
        mean2 = x2 @ params["mu_beta2"] + params["mu_bias2"]
        var2 = (x2 ** 2) @ (sb2 ** 2) + sbi2 ** 2
        out = mean2 + jnp.sqrt(var2) * eps2
    else:
        out = (x1 * p) @ params["mu_beta2"] + params["mu_bias2"]

    def gk(sb, mb):
        return jnp.sum((sb ** 2 + mb ** 2) / (2 * sigma ** 2)
                       - jnp.log(sb + eps) + np.log(sigma) - 0.5)

    kl = (gk(sb1, params["mu_beta1"]) + gk(sbi1, params["mu_bias1"])
          + gk(sb2, params["mu_beta2"]) + gk(sbi2, params["mu_bias2"])
          + jnp.sum(p * jnp.log(p + eps) + (1 - p) * jnp.log(1 - p + eps))
          - jnp.sum(p * np.log(p_prior + eps)
                    + (1 - p) * np.log(1 - p_prior + eps)))
    return out, kl


def init_params(key, num_gene, num_hidden):
    k = jax.random.split(key, 8)
    s1 = math.sqrt(6.0 / (num_gene + num_hidden))
    s2 = math.sqrt(6.0 / (num_hidden + 1))
    return {
        "mu_beta1": jax.random.uniform(k[0], (num_gene, num_hidden), jnp.float32, -s1, s1),
        "rho_beta1": jax.random.uniform(k[1], (num_gene, num_hidden), jnp.float32, -4.0, -2.0),
        "mu_bias1": jax.random.uniform(k[2], (num_hidden,), jnp.float32, -s1, s1),
        "rho_bias1": jax.random.uniform(k[3], (num_hidden,), jnp.float32, -4.0, -2.0),
        "mu_beta2": jax.random.uniform(k[4], (num_hidden, 1), jnp.float32, -s2, s2),
        "rho_beta2": jax.random.uniform(k[5], (num_hidden, 1), jnp.float32, -4.0, -2.0),
        "mu_bias2": jax.random.uniform(k[6], (1,), jnp.float32, -s2, s2),
        "rho_bias2": jax.random.uniform(k[7], (1,), jnp.float32, -4.0, -2.0),
        # init_min = init_max = 0.5  =>  logit(0.5) = 0
        "p_logit": jnp.zeros((num_hidden,), jnp.float32),
    }


if __name__ == "__main__":
    B, NUM_GENE, NUM_HIDDEN = 8, 256, 128
    SIGMA, P_SLAB = 0.5, 0.1

    root = jax.random.PRNGKey(0)
    k_param, k_x, k_e1, k_u, k_e2, k_p2, k_x2 = jax.random.split(root, 7)
    params = init_params(k_param, NUM_GENE, NUM_HIDDEN)
    x = jax.random.normal(k_x, (B, NUM_GENE), jnp.float32)
    out_ref, kl_ref = _reference_forward(x, params, sigma=SIGMA, p_prior=P_SLAB,
                                         training=False)

    # 1. eval, f32, auto tile size (generation-aware VMEM budget)
    out_eval, kl_eval = predictor_wide(x, params, sigma=SIGMA, p_prior=P_SLAB,
                                       training=False)
    jax.block_until_ready(out_eval)
    np.testing.assert_allclose(np.asarray(out_eval), np.asarray(out_ref),
                               rtol=1e-4, atol=2e-4)
    np.testing.assert_allclose(float(kl_eval), float(kl_ref), rtol=1e-4)

    # 2. eval, f32, forced block_g=128 (grid of 2: exercises the G pipeline)
    out_b, kl_b = predictor_wide(x, params, sigma=SIGMA, p_prior=P_SLAB,
                                 training=False, block_g=128)
    jax.block_until_ready(out_b)
    np.testing.assert_allclose(np.asarray(out_b), np.asarray(out_ref),
                               rtol=1e-4, atol=2e-4)
    np.testing.assert_allclose(float(kl_b), float(kl_ref), rtol=1e-4)

    # 3. eval with cached layer-1 KL: rho_beta1 never streamed, 3-deep pipeline
    kl1_cache = compute_kl_beta1(params, sigma=SIGMA)
    out_c, kl_c = predictor_wide(x, params, sigma=SIGMA, p_prior=P_SLAB,
                                 training=False, block_g=128,
                                 cached_kl_beta1=kl1_cache)
    jax.block_until_ready(out_c)
    np.testing.assert_allclose(np.asarray(out_c), np.asarray(out_ref),
                               rtol=1e-4, atol=2e-4)
    np.testing.assert_allclose(float(kl_c), float(kl_ref), rtol=1e-4)

    # 4. eval with KL disabled: mu-only stream
    out_nokl, _ = predictor_wide(x, params, sigma=SIGMA, p_prior=P_SLAB,
                                 training=False, compute_kl=False, block_g=128)
    jax.block_until_ready(out_nokl)
    np.testing.assert_allclose(np.asarray(out_nokl), np.asarray(out_ref),
                               rtol=1e-4, atol=2e-4)

    # 5. eval with bf16 mu+rho streaming (halves the dominant HBM read)
    out_bf, kl_bf = predictor_wide(x, params, sigma=SIGMA, p_prior=P_SLAB,
                                   training=False, block_g=128,
                                   weight_dtype=jnp.bfloat16)
    jax.block_until_ready(out_bf)
    np.testing.assert_allclose(np.asarray(out_bf), np.asarray(out_ref),
                               rtol=5e-2, atol=5e-2)
    np.testing.assert_allclose(float(kl_bf), float(kl_ref), rtol=5e-2)

    # 6. bf16 mu stream with f32 rho master copies (tight KL, halved mu bytes)
    out_bfr, kl_bfr = predictor_wide(x, params, sigma=SIGMA, p_prior=P_SLAB,
                                     training=False, block_g=128,
                                     weight_dtype=jnp.bfloat16,
                                     rho_dtype=jnp.float32)
    jax.block_until_ready(out_bfr)
    np.testing.assert_allclose(np.asarray(out_bfr), np.asarray(out_ref),
                               rtol=5e-2, atol=5e-2)
    np.testing.assert_allclose(float(kl_bfr), float(kl_ref), rtol=1e-4)

    # 7. training path (noise generated outside, consumed in-kernel)
    eps1 = jax.random.normal(k_e1, (B, NUM_HIDDEN), jnp.float32)
    unif = jax.random.uniform(k_u, (1, NUM_HIDDEN), jnp.float32,
                              minval=1e-4, maxval=1.0 - 1e-4)
    eps2 = jax.random.normal(k_e2, (B, 1), jnp.float32)
    out_tr, kl_tr = predictor_wide(x, params, sigma=SIGMA, p_prior=P_SLAB,
                                   training=True, block_g=128,
                                   eps1=eps1, unif=unif, eps2=eps2)
    jax.block_until_ready(out_tr)
    out_tr_ref, kl_tr_ref = _reference_forward(
        x, params, sigma=SIGMA, p_prior=P_SLAB, training=True,
        eps1=eps1, unif=unif, eps2=eps2)
    np.testing.assert_allclose(np.asarray(out_tr), np.asarray(out_tr_ref),
                               rtol=1e-4, atol=2e-4)
    np.testing.assert_allclose(float(kl_tr), float(kl_tr_ref), rtol=1e-4)
    assert np.isfinite(np.asarray(out_tr)).all() and np.isfinite(float(kl_tr))

    # 8. non-128-divisible gene count: padded tiles + analytic KL correction
    G_ODD = 200
    params_odd = init_params(k_p2, G_ODD, NUM_HIDDEN)
    x_odd = jax.random.normal(k_x2, (B, G_ODD), jnp.float32)
    out_o, kl_o = predictor_wide(x_odd, params_odd, sigma=SIGMA, p_prior=P_SLAB,
                                 training=False, block_g=128)
    jax.block_until_ready(out_o)
    out_o_ref, kl_o_ref = _reference_forward(x_odd, params_odd, sigma=SIGMA,
                                             p_prior=P_SLAB, training=False)
    np.testing.assert_allclose(np.asarray(out_o), np.asarray(out_o_ref),
                               rtol=1e-4, atol=2e-4)
    np.testing.assert_allclose(float(kl_o), float(kl_o_ref), rtol=2e-4)

    # TODO(synk): torch's `self.num_features = torch.sum(keep_prob)` module
    # side-effect is not replicated (pure-functional kernel).
    print("KERNEL_OK")
</pallas_src>

<mosaic_0001>
module attributes {stable_mosaic.version = 11 : i64} {
  func.func @kernel(%arg0: i32, %arg1: memref<8x256xf32, #tpu.memory_space<vmem>>, %arg2: memref<256x128xf32, #tpu.memory_space<vmem>>, %arg3: memref<256x128xf32, #tpu.memory_space<vmem>>, %arg4: memref<1x128xf32, #tpu.memory_space<vmem>>, %arg5: memref<1x128xf32, #tpu.memory_space<vmem>>, %arg6: memref<1x128xf32, #tpu.memory_space<vmem>>, %arg7: memref<1x128xf32, #tpu.memory_space<vmem>>, %arg8: memref<1x1xf32, #tpu.memory_space<vmem>>, %arg9: memref<1x1xf32, #tpu.memory_space<vmem>>, %arg10: memref<1x128xf32, #tpu.memory_space<vmem>>, %arg11: memref<8x1xf32, #tpu.memory_space<vmem>>, %arg12: memref<1x1xf32, #tpu.memory_space<vmem>>, %arg13: memref<8x128xf32, #tpu.memory_space<vmem>>, %arg14: memref<8x128xf32, #tpu.memory_space<vmem>>) attributes {dimension_semantics = [#tpu.dimension_semantics<arbitrary>], iteration_bounds = array<i64: 1>, scalar_prefetch = 0 : i64, scratch_operands = 2 : i64, tpu.core_type = #tpu.core_type<tc>, window_params = [{transform_indices = @transform_0, window_bounds = array<i64: 8, 256>}, {transform_indices = @transform_1, window_bounds = array<i64: 256, 128>}, {transform_indices = @transform_2, window_bounds = array<i64: 256, 128>}, {pipeline_mode = #tpu.pipeline_mode<synchronous>, transform_indices = @transform_3, window_bounds = array<i64: 1, 128>}, {pipeline_mode = #tpu.pipeline_mode<synchronous>, transform_indices = @transform_4, window_bounds = array<i64: 1, 128>}, {pipeline_mode = #tpu.pipeline_mode<synchronous>, transform_indices = @transform_5, window_bounds = array<i64: 1, 128>}, {pipeline_mode = #tpu.pipeline_mode<synchronous>, transform_indices = @transform_6, window_bounds = array<i64: 1, 128>}, {pipeline_mode = #tpu.pipeline_mode<synchronous>, transform_indices = @transform_7, window_bounds = array<i64: 1, 1>}, {pipeline_mode = #tpu.pipeline_mode<synchronous>, transform_indices = @transform_8, window_bounds = array<i64: 1, 1>}, {pipeline_mode = #tpu.pipeline_mode<synchronous>, transform_indices = @transform_9, window_bounds = array<i64: 1, 128>}, {pipeline_mode = #tpu.pipeline_mode<synchronous>, transform_indices = @transform_10, window_bounds = array<i64: 8, 1>}, {pipeline_mode = #tpu.pipeline_mode<synchronous>, transform_indices = @transform_11, window_bounds = array<i64: 1, 1>}]} {
    %c0_i32 = arith.constant 0 : i32
    %0 = arith.cmpi eq, %arg0, %c0_i32 : i32
    %1 = arith.extui %0 : i1 to i32
    %c0_i32_0 = arith.constant 0 : i32
    %2 = arith.cmpi ne, %1, %c0_i32_0 : i32
    scf.if %2 {
      %cst_24 = arith.constant 0.000000e+00 : f32
      %40 = vector.broadcast %cst_24 : f32 to vector<8x128xf32>
      %c0_25 = arith.constant 0 : index
      %c0_26 = arith.constant 0 : index
      %41 = vector.load %arg13[%c0_25, %c0_26] : memref<8x128xf32, #tpu.memory_space<vmem>>, vector<8x128xf32>
      tpu.vector_store %arg13[%c0_25, %c0_26], %40 {strides = array<i32>} : memref<8x128xf32, #tpu.memory_space<vmem>>, vector<8x128xf32>,
      %cst_27 = arith.constant 0.000000e+00 : f32
      %42 = vector.broadcast %cst_27 : f32 to vector<8x128xf32>
      %c0_28 = arith.constant 0 : index
      %c0_29 = arith.constant 0 : index
      %43 = vector.load %arg14[%c0_28, %c0_29] : memref<8x128xf32, #tpu.memory_space<vmem>>, vector<8x128xf32>
      tpu.vector_store %arg14[%c0_28, %c0_29], %42 {strides = array<i32>} : memref<8x128xf32, #tpu.memory_space<vmem>>, vector<8x128xf32>,
    } else {
    }
    %c0 = arith.constant 0 : index
    %c0_1 = arith.constant 0 : index
    %3 = vector.load %arg1[%c0, %c0_1] : memref<8x256xf32, #tpu.memory_space<vmem>>, vector<8x256xf32>
    %c0_2 = arith.constant 0 : index
    %c0_3 = arith.constant 0 : index
    %4 = vector.load %arg2[%c0_2, %c0_3] : memref<256x128xf32, #tpu.memory_space<vmem>>, vector<256x128xf32>
    %c0_4 = arith.constant 0 : index
    %c0_5 = arith.constant 0 : index
    %5 = vector.load %arg13[%c0_4, %c0_5] : memref<8x128xf32, #tpu.memory_space<vmem>>, vector<8x128xf32>
    %cst = arith.constant dense<0.000000e+00> : vector<8x128xf32>
    %6 = tpu.matmul %3, %4, %cst {dimension_numbers = #tpu.dot_dimension_numbers<[1], [0], [0], [1], [0, 0, 1, 1], [], []>} : vector<8x256xf32>, vector<256x128xf32>, vector<8x128xf32> -> vector<8x128xf32>
    %7 = arith.addf %5, %6 : vector<8x128xf32>
    %c0_6 = arith.constant 0 : index
    %c0_7 = arith.constant 0 : index
    %8 = vector.load %arg13[%c0_6, %c0_7] : memref<8x128xf32, #tpu.memory_space<vmem>>, vector<8x128xf32>
    tpu.vector_store %arg13[%c0_6, %c0_7], %7 {strides = array<i32>} : memref<8x128xf32, #tpu.memory_space<vmem>>, vector<8x128xf32>,
    %c0_8 = arith.constant 0 : index
    %c0_9 = arith.constant 0 : index
    %9 = vector.load %arg3[%c0_8, %c0_9] : memref<256x128xf32, #tpu.memory_space<vmem>>, vector<256x128xf32>
    %cst_10 = arith.constant 1.000000e+00 : f32
    %10 = vector.broadcast %cst_10 : f32 to vector<256x128xf32>
    %11 = arith.mulf %10, %9 : vector<256x128xf32>
    %cst_11 = arith.constant 2.000000e+01 : f32
    %12 = vector.broadcast %cst_11 : f32 to vector<256x128xf32>
    %13 = arith.minimumf %11, %12 : vector<256x128xf32>
    %14 = math.exp %13 : vector<256x128xf32>
    %cst_12 = arith.constant 1.000000e+00 : f32
    %15 = vector.broadcast %cst_12 : f32 to vector<256x128xf32>
    %16 = arith.addf %15, %14 : vector<256x128xf32>
    %17 = math.log %16 : vector<256x128xf32>
    %cst_13 = arith.constant 1.000000e+00 : f32
    %18 = vector.broadcast %cst_13 : f32 to vector<256x128xf32>
    %19 = arith.divf %17, %18 : vector<256x128xf32>
    %cst_14 = arith.constant 2.000000e+01 : f32
    %20 = vector.broadcast %cst_14 : f32 to vector<256x128xf32>
    %21 = arith.cmpf ogt, %11, %20 : vector<256x128xf32>
    %22 = arith.select %21, %9, %19 : vector<256x128xi1>, vector<256x128xf32>
    %23 = arith.mulf %22, %22 : vector<256x128xf32>
    %24 = arith.mulf %4, %4 : vector<256x128xf32>
    %25 = arith.addf %23, %24 : vector<256x128xf32>
    %cst_15 = arith.constant 2.000000e+00 : f32
    %26 = vector.broadcast %cst_15 : f32 to vector<256x128xf32>
    %27 = arith.mulf %25, %26 : vector<256x128xf32>
    %cst_16 = arith.constant 1.000000e-07 : f32
    %28 = vector.broadcast %cst_16 : f32 to vector<256x128xf32>
    %29 = arith.addf %22, %28 : vector<256x128xf32>
    %30 = math.log %29 : vector<256x128xf32>
    %31 = arith.subf %27, %30 : vector<256x128xf32>
    %c0_17 = arith.constant 0 : index
    %c0_18 = arith.constant 0 : index
    %32 = vector.load %arg14[%c0_17, %c0_18] : memref<8x128xf32, #tpu.memory_space<vmem>>, vector<8x128xf32>
    %33 = vector.shape_cast %31 : vector<256x128xf32> to vector<32x8x128xf32>
    %cst_19 = arith.constant dense<0.000000e+00> : vector<8x128xf32>
    %34 = vector.multi_reduction <add>, %33, %cst_19 [0] : vector<32x8x128xf32> to vector<8x128xf32>
    %35 = arith.addf %32, %34 : vector<8x128xf32>
    %c0_20 = arith.constant 0 : index
    %c0_21 = arith.constant 0 : index
    %36 = vector.load %arg14[%c0_20, %c0_21] : memref<8x128xf32, #tpu.memory_space<vmem>>, vector<8x128xf32>
    tpu.vector_store %arg14[%c0_20, %c0_21], %35 {strides = array<i32>} : memref<8x128xf32, #tpu.memory_space<vmem>>, vector<8x128xf32>,
    %c0_i32_22 = arith.constant 0 : i32
    %37 = arith.cmpi eq, %arg0, %c0_i32_22 : i32
    %38 = arith.extui %37 : i1 to i32
    %c0_i32_23 = arith.constant 0 : i32
    %39 = arith.cmpi ne, %38, %c0_i32_23 : i32
    scf.if %39 {
      %c0_24 = arith.constant 0 : index
      %c0_25 = arith.constant 0 : index
      %40 = vector.load %arg4[%c0_24, %c0_25] : memref<1x128xf32, #tpu.memory_space<vmem>>, vector<1x128xf32>
      %c0_26 = arith.constant 0 : index
      %c0_27 = arith.constant 0 : index
      %41 = vector.load %arg6[%c0_26, %c0_27] : memref<1x128xf32, #tpu.memory_space<vmem>>, vector<1x128xf32>
      %c0_28 = arith.constant 0 : index
      %c0_29 = arith.constant 0 : index
      %42 = vector.load %arg8[%c0_28, %c0_29] : memref<1x1xf32, #tpu.memory_space<vmem>>, vector<1x1xf32>
      %c0_30 = arith.constant 0 : index
      %c0_31 = arith.constant 0 : index
      %43 = vector.load %arg10[%c0_30, %c0_31] : memref<1x128xf32, #tpu.memory_space<vmem>>, vector<1x128xf32>
      %cst_32 = arith.constant 0.000000e+00 : f32
      %44 = vector.broadcast %cst_32 : f32 to vector<1x128xf32>
      %45 = arith.subf %44, %43 : vector<1x128xf32>
      %46 = math.exp %45 : vector<1x128xf32>
      %cst_33 = arith.constant 1.000000e+00 : f32
      %47 = vector.broadcast %cst_33 : f32 to vector<1x128xf32>
      %48 = arith.addf %47, %46 : vector<1x128xf32>
      %cst_34 = arith.constant 1.000000e+00 : f32
      %49 = vector.broadcast %cst_34 : f32 to vector<1x128xf32>
      %50 = arith.divf %49, %48 : vector<1x128xf32>
      %c0_35 = arith.constant 0 : index
      %c0_36 = arith.constant 0 : index
      %51 = vector.load %arg5[%c0_35, %c0_36] : memref<1x128xf32, #tpu.memory_space<vmem>>, vector<1x128xf32>
      %cst_37 = arith.constant 1.000000e+00 : f32
      %52 = vector.broadcast %cst_37 : f32 to vector<1x128xf32>
      %53 = arith.mulf %52, %51 : vector<1x128xf32>
      %cst_38 = arith.constant 2.000000e+01 : f32
      %54 = vector.broadcast %cst_38 : f32 to vector<1x128xf32>
      %55 = arith.minimumf %53, %54 : vector<1x128xf32>
      %56 = math.exp %55 : vector<1x128xf32>
      %cst_39 = arith.constant 1.000000e+00 : f32
      %57 = vector.broadcast %cst_39 : f32 to vector<1x128xf32>
      %58 = arith.addf %57, %56 : vector<1x128xf32>
      %59 = math.log %58 : vector<1x128xf32>
      %cst_40 = arith.constant 1.000000e+00 : f32
      %60 = vector.broadcast %cst_40 : f32 to vector<1x128xf32>
      %61 = arith.divf %59, %60 : vector<1x128xf32>
      %cst_41 = arith.constant 2.000000e+01 : f32
      %62 = vector.broadcast %cst_41 : f32 to vector<1x128xf32>
      %63 = arith.cmpf ogt, %53, %62 : vector<1x128xf32>
      %64 = arith.select %63, %51, %61 : vector<1x128xi1>, vector<1x128xf32>
      %c0_42 = arith.constant 0 : index
      %c0_43 = arith.constant 0 : index
      %65 = vector.load %arg7[%c0_42, %c0_43] : memref<1x128xf32, #tpu.memory_space<vmem>>, vector<1x128xf32>
      %cst_44 = arith.constant 1.000000e+00 : f32
      %66 = vector.broadcast %cst_44 : f32 to vector<1x128xf32>
      %67 = arith.mulf %66, %65 : vector<1x128xf32>
      %cst_45 = arith.constant 2.000000e+01 : f32
      %68 = vector.broadcast %cst_45 : f32 to vector<1x128xf32>
      %69 = arith.minimumf %67, %68 : vector<1x128xf32>
      %70 = math.exp %69 : vector<1x128xf32>
      %cst_46 = arith.constant 1.000000e+00 : f32
      %71 = vector.broadcast %cst_46 : f32 to vector<1x128xf32>
      %72 = arith.addf %71, %70 : vector<1x128xf32>
      %73 = math.log %72 : vector<1x128xf32>
      %cst_47 = arith.constant 1.000000e+00 : f32
      %74 = vector.broadcast %cst_47 : f32 to vector<1x128xf32>
      %75 = arith.divf %73, %74 : vector<1x128xf32>
      %cst_48 = arith.constant 2.000000e+01 : f32
      %76 = vector.broadcast %cst_48 : f32 to vector<1x128xf32>
      %77 = arith.cmpf ogt, %67, %76 : vector<1x128xf32>
      %78 = arith.select %77, %65, %75 : vector<1x128xi1>, vector<1x128xf32>
      %c0_49 = arith.constant 0 : index
      %c0_50 = arith.constant 0 : index
      %79 = vector.load %arg9[%c0_49, %c0_50] : memref<1x1xf32, #tpu.memory_space<vmem>>, vector<1x1xf32>
      %cst_51 = arith.constant 1.000000e+00 : f32
      %80 = vector.broadcast %cst_51 : f32 to vector<1x1xf32>
      %81 = arith.mulf %80, %79 : vector<1x1xf32>
      %cst_52 = arith.constant 2.000000e+01 : f32
      %82 = vector.broadcast %cst_52 : f32 to vector<1x1xf32>
      %83 = arith.minimumf %81, %82 : vector<1x1xf32>
      %84 = math.exp %83 : vector<1x1xf32>
      %cst_53 = arith.constant 1.000000e+00 : f32
      %85 = vector.broadcast %cst_53 : f32 to vector<1x1xf32>
      %86 = arith.addf %85, %84 : vector<1x1xf32>
      %87 = math.log %86 : vector<1x1xf32>
      %cst_54 = arith.constant 1.000000e+00 : f32
      %88 = vector.broadcast %cst_54 : f32 to vector<1x1xf32>
      %89 = arith.divf %87, %88 : vector<1x1xf32>
      %cst_55 = arith.constant 2.000000e+01 : f32
      %90 = vector.broadcast %cst_55 : f32 to vector<1x1xf32>
      %91 = arith.cmpf ogt, %81, %90 : vector<1x1xf32>
      %92 = arith.select %91, %79, %89 : vector<1x1xi1>, vector<1x1xf32>
      %c0_56 = arith.constant 0 : index
      %c0_57 = arith.constant 0 : index
      %93 = vector.load %arg13[%c0_56, %c0_57] : memref<8x128xf32, #tpu.memory_space<vmem>>, vector<8x128xf32>
      %94 = vector.broadcast %40 : vector<1x128xf32> to vector<8x128xf32>
      %95 = arith.addf %93, %94 : vector<8x128xf32>
      %cst_58 = arith.constant 1.000000e+01 : f32
      %96 = vector.broadcast %cst_58 : f32 to vector<8x128xf32>
      %97 = arith.mulf %96, %95 : vector<8x128xf32>
      %cst_59 = arith.constant 2.000000e+01 : f32
      %98 = vector.broadcast %cst_59 : f32 to vector<8x128xf32>
      %99 = arith.minimumf %97, %98 : vector<8x128xf32>
      %100 = math.exp %99 : vector<8x128xf32>
      %cst_60 = arith.constant 1.000000e+00 : f32
      %101 = vector.broadcast %cst_60 : f32 to vector<8x128xf32>
      %102 = arith.addf %101, %100 : vector<8x128xf32>
      %103 = math.log %102 : vector<8x128xf32>
      %cst_61 = arith.constant 1.000000e+01 : f32
      %104 = vector.broadcast %cst_61 : f32 to vector<8x128xf32>
      %105 = arith.divf %103, %104 : vector<8x128xf32>
      %cst_62 = arith.constant 2.000000e+01 : f32
      %106 = vector.broadcast %cst_62 : f32 to vector<8x128xf32>
      %107 = arith.cmpf ogt, %97, %106 : vector<8x128xf32>
      %108 = arith.select %107, %95, %105 : vector<8x128xi1>, vector<8x128xf32>
      %109 = arith.mulf %50, %41 : vector<1x128xf32>
      %110 = vector.broadcast %109 : vector<1x128xf32> to vector<8x128xf32>
      %111 = arith.mulf %108, %110 : vector<8x128xf32>
      %cst_63 = arith.constant dense<0.000000e+00> : vector<8xf32>
      %112 = vector.multi_reduction <add>, %111, %cst_63 [1] : vector<8x128xf32> to vector<8xf32>
      %113 = vector.shape_cast %112 : vector<8xf32> to vector<8x1xf32>
      %114 = vector.broadcast %42 : vector<1x1xf32> to vector<8x1xf32>
      %115 = arith.addf %113, %114 : vector<8x1xf32>
      %c0_64 = arith.constant 0 : index
      %c0_65 = arith.constant 0 : index
      %116 = vector.load %arg11[%c0_64, %c0_65] : memref<8x1xf32, #tpu.memory_space<vmem>>, vector<8x1xf32>
      tpu.vector_store %arg11[%c0_64, %c0_65], %115 {strides = array<i32>} : memref<8x1xf32, #tpu.memory_space<vmem>>, vector<8x1xf32>,
      %117 = arith.mulf %64, %64 : vector<1x128xf32>
      %118 = arith.mulf %40, %40 : vector<1x128xf32>
      %119 = arith.addf %117, %118 : vector<1x128xf32>
      %cst_66 = arith.constant 2.000000e+00 : f32
      %120 = vector.broadcast %cst_66 : f32 to vector<1x128xf32>
      %121 = arith.mulf %119, %120 : vector<1x128xf32>
      %cst_67 = arith.constant 1.000000e-07 : f32
      %122 = vector.broadcast %cst_67 : f32 to vector<1x128xf32>
      %123 = arith.addf %64, %122 : vector<1x128xf32>
      %124 = math.log %123 : vector<1x128xf32>
      %125 = arith.subf %121, %124 : vector<1x128xf32>
      %cst_68 = arith.constant -1.19314718 : f32
      %126 = vector.broadcast %cst_68 : f32 to vector<1x128xf32>
      %127 = arith.addf %125, %126 : vector<1x128xf32>
      %128 = vector.shape_cast %127 : vector<1x128xf32> to vector<1x1x128xf32>
      %cst_69 = arith.constant dense<0.000000e+00> : vector<1xf32>
      %129 = vector.multi_reduction <add>, %128, %cst_69 [1, 2] : vector<1x1x128xf32> to vector<1xf32>
      %130 = vector.shape_cast %129 : vector<1xf32> to vector<1x1x1xf32>
      %131 = vector.extract %130[0, 0, 0] : f32 from vector<1x1x1xf32>
      %132 = arith.mulf %78, %78 : vector<1x128xf32>
      %133 = arith.mulf %41, %41 : vector<1x128xf32>
      %134 = arith.addf %132, %133 : vector<1x128xf32>
      %cst_70 = arith.constant 2.000000e+00 : f32
      %135 = vector.broadcast %cst_70 : f32 to vector<1x128xf32>
      %136 = arith.mulf %134, %135 : vector<1x128xf32>
      %cst_71 = arith.constant 1.000000e-07 : f32
      %137 = vector.broadcast %cst_71 : f32 to vector<1x128xf32>
      %138 = arith.addf %78, %137 : vector<1x128xf32>
      %139 = math.log %138 : vector<1x128xf32>
      %140 = arith.subf %136, %139 : vector<1x128xf32>
      %cst_72 = arith.constant -1.19314718 : f32
      %141 = vector.broadcast %cst_72 : f32 to vector<1x128xf32>
      %142 = arith.addf %140, %141 : vector<1x128xf32>
      %143 = vector.shape_cast %142 : vector<1x128xf32> to vector<1x1x128xf32>
      %cst_73 = arith.constant dense<0.000000e+00> : vector<1xf32>
      %144 = vector.multi_reduction <add>, %143, %cst_73 [1, 2] : vector<1x1x128xf32> to vector<1xf32>
      %145 = vector.shape_cast %144 : vector<1xf32> to vector<1x1x1xf32>
      %146 = vector.extract %145[0, 0, 0] : f32 from vector<1x1x1xf32>
      %147 = arith.addf %131, %146 : f32
      %148 = arith.mulf %92, %92 : vector<1x1xf32>
      %149 = arith.mulf %42, %42 : vector<1x1xf32>
      %150 = arith.addf %148, %149 : vector<1x1xf32>
      %cst_74 = arith.constant 2.000000e+00 : f32
      %151 = vector.broadcast %cst_74 : f32 to vector<1x1xf32>
      %152 = arith.mulf %150, %151 : vector<1x1xf32>
      %cst_75 = arith.constant 1.000000e-07 : f32
      %153 = vector.broadcast %cst_75 : f32 to vector<1x1xf32>
      %154 = arith.addf %92, %153 : vector<1x1xf32>
      %155 = math.log %154 : vector<1x1xf32>
      %156 = arith.subf %152, %155 : vector<1x1xf32>
      %cst_76 = arith.constant -1.19314718 : f32
      %157 = vector.broadcast %cst_76 : f32 to vector<1x1xf32>
      %158 = arith.addf %156, %157 : vector<1x1xf32>
      %159 = vector.shape_cast %158 : vector<1x1xf32> to vector<1x1x1xf32>
      %cst_77 = arith.constant dense<0.000000e+00> : vector<1xf32>
      %160 = vector.multi_reduction <add>, %159, %cst_77 [1, 2] : vector<1x1x1xf32> to vector<1xf32>
      %161 = vector.shape_cast %160 : vector<1xf32> to vector<1x1x1xf32>
      %162 = vector.extract %161[0, 0, 0] : f32 from vector<1x1x1xf32>
      %163 = arith.addf %147, %162 : f32
      %cst_78 = arith.constant 1.000000e-07 : f32
      %164 = vector.broadcast %cst_78 : f32 to vector<1x128xf32>
      %165 = arith.addf %50, %164 : vector<1x128xf32>
      %166 = math.log %165 : vector<1x128xf32>
      %167 = arith.mulf %50, %166 : vector<1x128xf32>
      %cst_79 = arith.constant 1.000000e+00 : f32
      %168 = vector.broadcast %cst_79 : f32 to vector<1x128xf32>
      %169 = arith.subf %168, %50 : vector<1x128xf32>
      %cst_80 = arith.constant 1.000000e+00 : f32
      %170 = vector.broadcast %cst_80 : f32 to vector<1x128xf32>
      %171 = arith.subf %170, %50 : vector<1x128xf32>
      %cst_81 = arith.constant 1.000000e-07 : f32
      %172 = vector.broadcast %cst_81 : f32 to vector<1x128xf32>
      %173 = arith.addf %171, %172 : vector<1x128xf32>
      %174 = math.log %173 : vector<1x128xf32>
      %175 = arith.mulf %169, %174 : vector<1x128xf32>
      %176 = arith.addf %167, %175 : vector<1x128xf32>
      %177 = vector.shape_cast %176 : vector<1x128xf32> to vector<1x1x128xf32>
      %cst_82 = arith.constant dense<0.000000e+00> : vector<1xf32>
      %178 = vector.multi_reduction <add>, %177, %cst_82 [1, 2] : vector<1x1x128xf32> to vector<1xf32>
      %179 = vector.shape_cast %178 : vector<1xf32> to vector<1x1x1xf32>
      %180 = vector.extract %179[0, 0, 0] : f32 from vector<1x1x1xf32>
      %181 = arith.addf %163, %180 : f32
      %cst_83 = arith.constant -2.30258417 : f32
      %182 = vector.broadcast %cst_83 : f32 to vector<1x128xf32>
      %183 = arith.mulf %50, %182 : vector<1x128xf32>
      %cst_84 = arith.constant 1.000000e+00 : f32
      %184 = vector.broadcast %cst_84 : f32 to vector<1x128xf32>
      %185 = arith.subf %184, %50 : vector<1x128xf32>
      %cst_85 = arith.constant -0.105360404 : f32
      %186 = vector.broadcast %cst_85 : f32 to vector<1x128xf32>
      %187 = arith.mulf %185, %186 : vector<1x128xf32>
      %188 = arith.addf %183, %187 : vector<1x128xf32>
      %189 = vector.shape_cast %188 : vector<1x128xf32> to vector<1x1x128xf32>
      %cst_86 = arith.constant dense<0.000000e+00> : vector<1xf32>
      %190 = vector.multi_reduction <add>, %189, %cst_86 [1, 2] : vector<1x1x128xf32> to vector<1xf32>
      %191 = vector.shape_cast %190 : vector<1xf32> to vector<1x1x1xf32>
      %192 = vector.extract %191[0, 0, 0] : f32 from vector<1x1x1xf32>
      %193 = arith.subf %181, %192 : f32
      %c0_87 = arith.constant 0 : index
      %c0_88 = arith.constant 0 : index
      %194 = vector.load %arg14[%c0_87, %c0_88] : memref<8x128xf32, #tpu.memory_space<vmem>>, vector<8x128xf32>
      %195 = vector.shape_cast %194 : vector<8x128xf32> to vector<1x8x128xf32>
      %cst_89 = arith.constant dense<0.000000e+00> : vector<1xf32>
      %196 = vector.multi_reduction <add>, %195, %cst_89 [1, 2] : vector<1x8x128xf32> to vector<1xf32>
      %197 = vector.shape_cast %196 : vector<1xf32> to vector<1x1x1xf32>
      %198 = vector.extract %197[0, 0, 0] : f32 from vector<1x1x1xf32>
      %199 = vector.broadcast %198 : f32 to vector<1x1xf32>
      %200 = vector.broadcast %193 : f32 to vector<1x1xf32>
      %201 = arith.addf %199, %200 : vector<1x1xf32>
      %c0_90 = arith.constant 0 : index
      %c0_91 = arith.constant 0 : index
      %202 = vector.load %arg12[%c0_90, %c0_91] : memref<1x1xf32, #tpu.memory_space<vmem>>, vector<1x1xf32>
      tpu.vector_store %arg12[%c0_90, %c0_91], %201 {strides = array<i32>} : memref<1x1xf32, #tpu.memory_space<vmem>>, vector<1x1xf32>,
    } else {
    }
    return
  }
  func.func @transform_0(%arg0: i32) -> (i32, i32) {
    %c0_i32 = arith.constant 0 : i32
    %c0_i32_0 = arith.constant 0 : i32
    return %c0_i32, %arg0 : i32, i32
  }
  func.func @transform_1(%arg0: i32) -> (i32, i32) {
    %c0_i32 = arith.constant 0 : i32
    %c0_i32_0 = arith.constant 0 : i32
    return %arg0, %c0_i32 : i32, i32
  }
  func.func @transform_2(%arg0: i32) -> (i32, i32) {
    %c0_i32 = arith.constant 0 : i32
    %c0_i32_0 = arith.constant 0 : i32
    return %arg0, %c0_i32 : i32, i32
  }
  func.func @transform_3(%arg0: i32) -> (i32, i32) {
    %c0_i32 = arith.constant 0 : i32
    %c0_i32_0 = arith.constant 0 : i32
    %c0_i32_1 = arith.constant 0 : i32
    return %c0_i32, %c0_i32_0 : i32, i32
  }
  func.func @transform_4(%arg0: i32) -> (i32, i32) {
    %c0_i32 = arith.constant 0 : i32
    %c0_i32_0 = arith.constant 0 : i32
    %c0_i32_1 = arith.constant 0 : i32
    return %c0_i32, %c0_i32_0 : i32, i32
  }
  func.func @transform_5(%arg0: i32) -> (i32, i32) {
    %c0_i32 = arith.constant 0 : i32
    %c0_i32_0 = arith.constant 0 : i32
    %c0_i32_1 = arith.constant 0 : i32
    return %c0_i32, %c0_i32_0 : i32, i32
  }
  func.func @transform_6(%arg0: i32) -> (i32, i32) {
    %c0_i32 = arith.constant 0 : i32
    %c0_i32_0 = arith.constant 0 : i32
    %c0_i32_1 = arith.constant 0 : i32
    return %c0_i32, %c0_i32_0 : i32, i32
  }
  func.func @transform_7(%arg0: i32) -> (i32, i32) {
    %c0_i32 = arith.constant 0 : i32
    %c0_i32_0 = arith.constant 0 : i32
    %c0_i32_1 = arith.constant 0 : i32
    return %c0_i32, %c0_i32_0 : i32, i32
  }
  func.func @transform_8(%arg0: i32) -> (i32, i32) {
    %c0_i32 = arith.constant 0 : i32
    %c0_i32_0 = arith.constant 0 : i32
    %c0_i32_1 = arith.constant 0 : i32
    return %c0_i32, %c0_i32_0 : i32, i32
  }
  func.func @transform_9(%arg0: i32) -> (i32, i32) {
    %c0_i32 = arith.constant 0 : i32
    %c0_i32_0 = arith.constant 0 : i32
    %c0_i32_1 = arith.constant 0 : i32
    return %c0_i32, %c0_i32_0 : i32, i32
  }
  func.func @transform_10(%arg0: i32) -> (i32, i32) {
    %c0_i32 = arith.constant 0 : i32
    %c0_i32_0 = arith.constant 0 : i32
    %c0_i32_1 = arith.constant 0 : i32
    return %c0_i32, %c0_i32_0 : i32, i32
  }
  func.func @transform_11(%arg0: i32) -> (i32, i32) {
    %c0_i32 = arith.constant 0 : i32
    %c0_i32_0 = arith.constant 0 : i32
    %c0_i32_1 = arith.constant 0 : i32
    return %c0_i32, %c0_i32_0 : i32, i32
  }
}

</mosaic_0001>

<bundles_post_ra>
// kernel: tpu_custom_call.1
= control target key start
LH: loop header
LB: loop body
LE: loop exit
PB: predicated region body
PF: predicated region fallthrough
CT: control target
= control target key end

     0   :  { %s2102_s0 = inlined_call_operand.hbm [shape: f32[8,256], index: 0, kind: input, shape index: {}]   ;;  %s2103_s1 = inlined_call_operand.hbm [shape: f32[256,128], index: 1, kind: input, shape index: {}]   ;;  %s2104_s2 = inlined_call_operand.hbm [shape: f32[256,128], index: 2, kind: input, shape index: {}]   ;;  %s2105_s3 = inlined_call_operand.vmem [shape: f32[1,128], index: 3, kind: input, shape index: {}]   ;;  %s2106_s4 = inlined_call_operand.vmem [shape: f32[1,128], index: 4, kind: input, shape index: {}]   ;;  %s2107_s5 = inlined_call_operand.vmem [shape: f32[1,128], index: 5, kind: input, shape index: {}]   ;;  %s2108_s6 = inlined_call_operand.vmem [shape: f32[1,128], index: 6, kind: input, shape index: {}]   ;;  %s2109_s7 = inlined_call_operand.<no memory space> [shape: f32[1,1], index: 7, kind: input, shape index: {}]   ;;  %s2110_s9 = inlined_call_operand.vmem [shape: f32[1,128], index: 9, kind: input, shape index: {}]   ;;  %s2111_s10 = inlined_call_operand.vmem [shape: f32[8,1], index: 10, kind: output, shape index: {0}]   ;;  %s2112_s11 = inlined_call_operand.hbm [shape: f32[1,1], index: 11, kind: output, shape index: {1}]   ;;  %s2113_s8 = inlined_call_operand.<no memory space> [shape: f32[1,1], index: 8, kind: input, shape index: {}]  }
   0x1   :  { %v17_v0 = vstv %s2109_s7  ;;  %v19_v1 = vstv %s2113_s8 }
   0x2   :  { %18 = vst [vmem:[#allocation4] sm:$0x1] %v17_v0  ;;  %20 = vst [vmem:[#allocation5] sm:$0x1] %v19_v1 }
   0x3   :  { %21 = vsyncpa [#allocation7], 0 }
   0x4   :  { %22 = vsyncpa [#allocation10], 0 }
   0x5   :  { %23 = vsyncpa [#allocation8], 0  ;;  %s1373_s21 = smov [#allocation9]   ;;  %s1279_s25 = scalar_lea.hbm %s2103_s1, 4096 }
   0x6   :  { %s39_s22 = sshll.u32 %s1373_s21, 4  ;;  %p1280_p0 = scmp.ne.s32.totalorder %s2103_s1, %s1279_s25  ;;  %s40_s22 = int_to_ptr.vmem [resolvable:$true] %s39_s22 }
   0x7   :  { %p1283_p1 = scmp.lt.u32.totalorder %s1279_s25, %s2103_s1 }
   0x9   :  { %p1285_p2 = pnand %p1283_p1, %p1280_p0 }
   0xb   :  { %1288 = shalt.err (!%p1285_p2)
}
   0xc   :  { %s1289_s8 = scalar_lea.vmem %s40_s22, 4096  ;;  %p1294_p4 = scmp.lt.s32.totalorder %s40_s22, %s40_s22 }
   0xd   :  { %p1290_p3 = scmp.ne.s32.totalorder %s40_s22, %s1289_s8  ;;  %p1295_p5 = scmp.lt.s32.totalorder %s1289_s8, %s1289_s8 }
   0xf   :  { %p1296_p6 = por %p1295_p5, %p1294_p4 }
  0x11   :  { %p1297_p7 = pnand %p1296_p6, %p1290_p3 }
  0x13   :  { %1300 = shalt.err (!%p1297_p7)
}
  0x14   :  { %s1374_s29 = smov 128   ;;  %s1375_s30 = smov 8  }
  0x15   :  { %45 = dma.hbm_to_vmem [thread:$0]  %s2103_s1, 4096, %s40_s22, [#allocation10], %s1374_s29, %s1374_s29, %s1375_s30  }
  0x16   :  { %s1376_s14 = smov [#allocation6]   ;;  %s1377_s16 = smov [#allocation11]  }
  0x17   :  { %s30_s15 = sshll.u32 %s1376_s14, 4  ;;  %s51_s17 = sshll.u32 %s1377_s16, 4  ;;  %s31_s15 = int_to_ptr.vmem [resolvable:$true] %s30_s15  ;;  %s52_s17 = int_to_ptr.vmem [resolvable:$true] %s51_s17 }
  0x18   :  { %s1301_s20 = scalar_lea.hbm %s2102_s0, 256 }
  0x19   :  { %p1302_p8 = scmp.ne.s32.totalorder %s2102_s0, %s1301_s20  ;;  %p1305_p9 = scmp.lt.u32.totalorder %s1301_s20, %s2102_s0 }
  0x1b   :  { %p1307_p10 = pnand %p1305_p9, %p1302_p8 }
  0x1d   :  { %1310 = shalt.err (!%p1307_p10)
}
  0x1e   :  { %s1311_s1 = scalar_lea.vmem %s31_s15, 256  ;;  %p1316_p12 = scmp.lt.s32.totalorder %s31_s15, %s31_s15 }
  0x1f   :  { %p1312_p11 = scmp.ne.s32.totalorder %s31_s15, %s1311_s1  ;;  %p1317_p13 = scmp.lt.s32.totalorder %s1311_s1, %s1311_s1 }
  0x21   :  { %p1318_p0 = por %p1317_p13, %p1316_p12 }
  0x23   :  { %p1319_p1 = pnand %p1318_p0, %p1312_p11 }
  0x25   :  { %1322 = shalt.err (!%p1319_p1)
}
  0x26   :  { %33 = dma.hbm_to_vmem [thread:$0]  %s2102_s0, 256, %s31_s15, [#allocation7]  }
  0x27   :  { %s1323_s28 = scalar_lea.hbm %s2104_s2, 4096 }
  0x28   :  { %p1324_p2 = scmp.ne.s32.totalorder %s2104_s2, %s1323_s28  ;;  %p1327_p3 = scmp.lt.u32.totalorder %s1323_s28, %s2104_s2 }
  0x2a   :  { %p1329_p4 = pnand %p1327_p3, %p1324_p2 }
  0x2c   :  { %1332 = shalt.err (!%p1329_p4)
}
  0x2d   :  { %s1333_s16 = scalar_lea.vmem %s52_s17, 4096  ;;  %p1338_p6 = scmp.lt.s32.totalorder %s52_s17, %s52_s17 }
  0x2e   :  { %p1334_p5 = scmp.ne.s32.totalorder %s52_s17, %s1333_s16  ;;  %p1339_p7 = scmp.lt.s32.totalorder %s1333_s16, %s1333_s16 }
  0x30   :  { %p1340_p8 = por %p1339_p7, %p1338_p6 }
  0x32   :  { %p1341_p9 = pnand %p1340_p8, %p1334_p5 }
  0x34   :  { %1344 = shalt.err (!%p1341_p9)
}
  0x35   :  { %57 = dma.hbm_to_vmem [thread:$0]  %s2104_s2, 4096, %s52_s17, [#allocation10], %s1374_s29, %s1374_s29, %s1375_s30  }
  0x36   :  { %1367 = dma.done.wait [#allocation7], 256  }
  0x37   :  { %1368 = vsyncadd [#allocation7], 4294967040 }
  0x38   :  { %1369 = dma.done.wait [#allocation10], 8192  }
  0x39   :  { %1370 = vsyncadd [#allocation10], 4294959104  ;;  %v1487_v2 = vld [vmem:[#allocation9 + $0x80] sm:$0xff]  ;;  %v1489_v3 = vld [vmem:[#allocation9 + $0x88] sm:$0xff]  ;;  %s1378_s27 = smov [#allocation12]  }
  0x3a   :  { %v1007_v4 = vpack.c.bf16 %v1489_v3, %v1487_v2  ;;  %v1493_v5 = vld [vmem:[#allocation9] sm:$0xff]  ;;  %v1495_v6 = vld [vmem:[#allocation9 + $0x8] sm:$0xff]  ;;  %v1503_v10 = vld [vmem:[#allocation9 + $0x90] sm:$0xff]  ;;  %s960_s7 = sshll.u32 %s1378_s27, 4  ;;  %s961_s7 = int_to_ptr.vmem [resolvable:$true] %s960_s7 }
  0x3b   :  { %v1009_v7 = vpack.c.bf16 %v1495_v6, %v1493_v5  ;;  %v1499_v8 = vld [vmem:[#allocation11] sm:$0xff]  ;;  %v1501_v9 = vld [vmem:[#allocation11 + $0x8] sm:$0xff]  ;;  %v1507_v13 = vld [vmem:[#allocation9 + $0x98] sm:$0xff]  ;;  %s1345_s8 = scalar_lea.vmem %s961_s7, 16  ;;  %s1349_s12 = scalar_lea.vmem %s961_s7, 32 }
  0x3c   :  { %1008 = vmatprep.subr.bf16.mxu0 %v1007_v4  ;;  %v226_v11 = vmin.f32 %v1499_v8, 20.0  ;;  %v227_v12 = vmin.f32 %v1501_v9, 20.0  ;;  %v1011_v16 = vpack.c.bf16 %v1507_v13, %v1503_v10  ;;  %v1511_v17 = vld [vmem:[#allocation9 + $0x10] sm:$0xff]  ;;  %v1513_v18 = vld [vmem:[#allocation9 + $0x18] sm:$0xff]  ;;  %v1519_v21 = vld [vmem:[#allocation9 + $0xa0] sm:$0xff]  ;;  %vm418_vm0 = vcmp.gt.f32.partialorder %v1499_v8, 20.0  ;;  %p1346_p10 = scmp.ne.s32.totalorder %s961_s7, %s1345_s8  ;;  %p1350_p11 = scmp.lt.s32.totalorder %s961_s7, %s961_s7 }
  0x3d   :  { %1010 = vmatpush3.bf16.msra.mxu0 %v1009_v7  ;;  %v1515_v19 = vld [vmem:[#allocation11 + $0x10] sm:$0xff]  ;;  %v1517_v20 = vld [vmem:[#allocation11 + $0x18] sm:$0xff]  ;;  %v1521_v22 = vld [vmem:[#allocation9 + $0xa8] sm:$0xff]  ;;  %v1013_v23 = vpack.c.bf16 %v1513_v18, %v1511_v17  ;;  %vm419_vm1 = vcmp.gt.f32.partialorder %v1501_v9, 20.0  ;;  %p1351_p12 = scmp.lt.s32.totalorder %s1349_s12, %s1345_s8 }
  0x3e   :  { %v258_v14 = vmul.f32 1.442695, %v226_v11  ;;  %v260_v15 = vmul.f32 1.442695, %v227_v12  ;;  %1012 = vmatprep.subr.bf16.mxu0 %v1011_v16  ;;  %v228_v24 = vmin.f32 %v1515_v19, 20.0  ;;  %v229_v25 = vmin.f32 %v1517_v20, 20.0 }
  0x3f   :  { %v1015_v26 = vpack.c.bf16 %v1521_v22, %v1519_v21  ;;  %v1529_v27 = vld [vmem:[#allocation9 + $0x20] sm:$0xff]  ;;  %v1531_v28 = vld [vmem:[#allocation9 + $0x28] sm:$0xff]  ;;  %v1535_v32 = vld [vmem:[#allocation9 + $0xb0] sm:$0xff]  ;;  %vm420_vm2 = vcmp.gt.f32.partialorder %v1515_v19, 20.0  ;;  %vm421_vm3 = vcmp.gt.f32.partialorder %v1517_v20, 20.0  ;;  %p1352_p13 = por %p1351_p12, %p1350_p11 }
  0x40   :  { %1057 = vpow2.f32 %v258_v14  ;;  %v262_v29 = vmul.f32 1.442695, %v228_v24  ;;  %v264_v30 = vmul.f32 1.442695, %v229_v25  ;;  %v1017_v31 = vpack.c.bf16 %v1531_v28, %v1529_v27  ;;  %v1537_v33 = vld [vmem:[#allocation9 + $0xb8] sm:$0xff]  ;;  %v1541_v38 = vld [vmem:[#allocation9 + $0x30] sm:$0xff] }
  0x41   :  { %1059 = vpow2.f32 %v260_v15  ;;  %1014 = vmatpush3.bf16.msra.mxu0 %v1013_v23  ;;  %v1019_v35 = vpack.c.bf16 %v1537_v33, %v1535_v32  ;;  %v1543_v39 = vld [vmem:[#allocation9 + $0x38] sm:$0xff]  ;;  %v1547_v42 = vld [vmem:[#allocation11 + $0x20] sm:$0xff]  ;;  %v1551_v44 = vld [vmem:[#allocation9 + $0xc8] sm:$0xff]  ;;  %p1353_p0 = pnand %p1352_p13, %p1346_p10 }
  0x42   :  { %1016 = vmatprep.subr.bf16.mxu0 %v1015_v26  ;;  %1061 = vpow2.f32 %v262_v29  ;;  %v1021_v41 = vpack.c.bf16 %v1543_v39, %v1541_v38  ;;  %v1549_v43 = vld [vmem:[#allocation9 + $0xc0] sm:$0xff]  ;;  %v1555_v48 = vld [vmem:[#allocation11 + $0x88] sm:$0xff]  ;;  %v88_v50 = vld [vmem:[#allocation6 + $0x8] sm:$0xff]  ;;  %v230_v53 = vmin.f32 %v1547_v42, 20.0  ;;  %vm422_vm6 = vcmp.gt.f32.partialorder %v1547_v42, 20.0 }
  0x43   :  { %1063 = vpow2.f32 %v264_v30  ;;  %v1553_v46 = vld [vmem:[#allocation11 + $0x80] sm:$0xff]  ;;  %v1557_v52 = vld [vmem:[#allocation11 + $0x28] sm:$0xff]  ;;  %v1023_v54 = vpack.c.bf16 %v1551_v44, %v1549_v43  ;;  %186 = vmatprep.mubr.f32.mxu0 %v88_v50  ;;  %v243_v58 = vmin.f32 %v1555_v48, 20.0  ;;  %v1573_v7 = vld [vmem:[#allocation11 + $0x90] sm:$0xff]  ;;  %vm435_vm5 = vcmp.gt.f32.partialorder %v1555_v48, 20.0 }
  0x44   :  { %v242_v55 = vmin.f32 %v1553_v46, 20.0  ;;  %v1563_v56 = vld [vmem:[#allocation9 + $0x40] sm:$0xff]  ;;  %v1565_v57 = vld [vmem:[#allocation9 + $0x48] sm:$0xff]  ;;  %v231_v59 = vmin.f32 %v1557_v52, 20.0  ;;  %v266_v60 = vmul.f32 1.442695, %v230_v53 }
  0x45   :  { %1018 = vmatpush3.bf16.msra.mxu0 %v1017_v31  ;;  %v1025_v61 = vpack.c.bf16 %v1565_v57, %v1563_v56  ;;  %v292_v1 = vmul.f32 1.442695, %v243_v58  ;;  %v1575_v12 = vld [vmem:[#allocation11 + $0x98] sm:$0xff]  ;;  %v244_v23 = vmin.f32 %v1573_v7, 20.0  ;;  %v1581_v30 = vld [vmem:[#allocation11 + $0xa0] sm:$0xff]  ;;  %v1595_v53 = vld [vmem:[#allocation11 + $0x30] sm:$0xff] }
  0x46   :  { %1020 = vmatprep.subr.bf16.mxu0 %v1019_v35  ;;  %v290_v63 = vmul.f32 1.442695, %v242_v55  ;;  %v268_v14 = vmul.f32 1.442695, %v231_v59  ;;  %v245_v25 = vmin.f32 %v1575_v12, 20.0  ;;  %vm434_vm4 = vcmp.gt.f32.partialorder %v1553_v46, 20.0 }
  0x47   :  { %vm423_vm7 = vcmp.gt.f32.partialorder %v1557_v52, 20.0  ;;  %vm436_vm8 = vcmp.gt.f32.partialorder %v1573_v7, 20.0  ;;  %vm437_vm9 = vcmp.gt.f32.partialorder %v1575_v12, 20.0  ;;  %vm438_vm10 = vcmp.gt.f32.partialorder %v1581_v30, 20.0 }
  0x48   :  { %vm424_vm12 = vcmp.gt.f32.partialorder %v1595_v53, 20.0 }
  0x49   :  { %1022 = vmatpush3.bf16.msra.mxu0 %v1021_v41  ;;  %v296_v41 = vmul.f32 1.442695, %v245_v25  ;;  %v1605_v25 = vld [vmem:[#allocation11 + $0x40] sm:$0xff] }
  0x4a   :  { %v1058_v34 = vpop.eup %1057  ;;  %1024 = vmatprep.subr.bf16.mxu0 %v1023_v54  ;;  %vm426_vm14 = vcmp.gt.f32.partialorder %v1605_v25, 20.0 }
  0x4b   :  { %v1060_v36 = vpop.eup %1059  ;;  %v322_v37 = vadd.f32 1.0, %v1058_v34  ;;  %v514_v34 = vmul.f32 %v1493_v5, %v1493_v5 }
  0x4c   :  { %v323_v40 = vadd.f32 1.0, %v1060_v36  ;;  %v1062_v45 = vpop.eup %1061  ;;  %v294_v36 = vmul.f32 1.442695, %v244_v23 }
  0x4d   :  { %1065 = vlog2.f32 %v322_v37  ;;  %v1064_v47 = vpop.eup %1063  ;;  %v324_v49 = vadd.f32 1.0, %v1062_v45  ;;  %1026 = vmatpush3.bf16.msra.mxu0 %v1025_v61  ;;  %v246_v45 = vmin.f32 %v1581_v30, 20.0 }
  0x4e   :  { %1067 = vlog2.f32 %v323_v40  ;;  %v325_v51 = vadd.f32 1.0, %v1064_v47 }
  0x4f   :  { %1069 = vlog2.f32 %v324_v49  ;;  %v298_v59 = vmul.f32 1.442695, %v246_v45 }
  0x50   :  { %1071 = vlog2.f32 %v325_v51 }
  0x51   :  { %1073 = vpow2.f32 %v266_v60 }
  0x52   :  { %1075 = vpow2.f32 %v290_v63 }
  0x53   :  { %1077 = vpow2.f32 %v292_v1 }
  0x54   :  { %1079 = vpow2.f32 %v268_v14  ;;  %v517_v14 = vmul.f32 %v1513_v18, %v1513_v18 }
  0x57   :  { %v1066_v62 = vpop.eup %1065 }
  0x58   :  { %v1068_v0 = vpop.eup %1067  ;;  %v355_v4 = vmul.f32 0.6931472, %v1066_v62  ;;  %v1597_v62 = vld [vmem:[#allocation11 + $0x38] sm:$0xff] }
  0x59   :  { %v357_v11 = vmul.f32 0.6931472, %v1068_v0  ;;  %v1070_v26 = vpop.eup %1069  ;;  %v516_v0 = vmul.f32 %v1511_v17, %v1511_v17  ;;  %vm425_vm13 = vcmp.gt.f32.partialorder %v1597_v62, 20.0 }
  0x5a   :  { %v450_v15 = vsel %vm418_vm0, %v1499_v8, %v355_v4  ;;  %v1072_v31 = vpop.eup %1071  ;;  %v515_v8 = vmul.f32 %v1495_v6, %v1495_v6  ;;  %v359_v37 = vmul.f32 0.6931472, %v1070_v26 }
  0x5b   :  { %v451_v16 = vsel %vm419_vm1, %v1501_v9, %v357_v11  ;;  %v610_v24 = vadd.f32 1e-07, %v450_v15  ;;  %v1588_v9 = vld [vmem:[#allocation11 + $0xa8] sm:$0xff]  ;;  %v482_v35 = vmul.f32 %v450_v15, %v450_v15  ;;  %v361_v47 = vmul.f32 0.6931472, %v1072_v31  ;;  %v1074_v54 = vpop.eup %1073 }
  0x5c   :  { %v611_v29 = vadd.f32 1e-07, %v451_v16  ;;  %v483_v40 = vmul.f32 %v451_v16, %v451_v16  ;;  %v452_v5 = vsel %vm420_vm2, %v1515_v19, %v359_v37  ;;  %v247_v6 = vmin.f32 %v1588_v9, 20.0  ;;  %v1076_v60 = vpop.eup %1075 }
  0x5d   :  { %1081 = vlog2.f32 %v610_v24  ;;  %v612_v49 = vadd.f32 1e-07, %v452_v5  ;;  %v546_v50 = vadd.f32 %v514_v34, %v482_v35  ;;  %v453_v51 = vsel %vm421_vm3, %v1517_v20, %v361_v47  ;;  %v1078_v19 = vpop.eup %1077  ;;  %v1607_v34 = vld [vmem:[#allocation11 + $0x48] sm:$0xff] }
  0x5e   :  { %1083 = vlog2.f32 %v611_v29  ;;  %v547_v55 = vadd.f32 %v515_v8, %v483_v40  ;;  %v613_v58 = vadd.f32 1e-07, %v453_v51  ;;  %v300_v61 = vmul.f32 1.442695, %v247_v6  ;;  %v1080_v1 = vpop.eup %1079  ;;  %v1611_v6 = vld [vmem:[#allocation9 + $0xd0] sm:$0xff] }
  0x5f   :  { %1085 = vpow2.f32 %v294_v36  ;;  %v484_v63 = vmul.f32 %v452_v5, %v452_v5  ;;  %v232_v20 = vmin.f32 %v1595_v53, 20.0  ;;  %v578_v4 = vmul.f32 2.0, %v546_v50 }
  0x60   :  { %1087 = vpow2.f32 %v296_v41  ;;  %v485_v11 = vmul.f32 %v453_v51, %v453_v51  ;;  %v326_v15 = vadd.f32 1.0, %v1074_v54  ;;  %v579_v23 = vmul.f32 2.0, %v547_v55 }
  0x61   :  { %1089 = vlog2.f32 %v612_v49  ;;  %v233_v24 = vmin.f32 %v1597_v62, 20.0  ;;  %v338_v29 = vadd.f32 1.0, %v1076_v60  ;;  %v339_v17 = vadd.f32 1.0, %v1078_v19  ;;  %v1613_v49 = vld [vmem:[#allocation9 + $0xd8] sm:$0xff] }
  0x62   :  { %1091 = vlog2.f32 %v613_v58  ;;  %v548_v35 = vadd.f32 %v516_v0, %v484_v63  ;;  %v327_v36 = vadd.f32 1.0, %v1080_v1  ;;  %v270_v37 = vmul.f32 1.442695, %v232_v20  ;;  %2117 = vst [vmem:[#allocation16_spill] sm:$0xff] %v1613_v49 }
  0x63   :  { %1093 = vpow2.f32 %v298_v59  ;;  %v549_v40 = vadd.f32 %v517_v14, %v485_v11  ;;  %v234_v41 = vmin.f32 %v1605_v25, 20.0  ;;  %v272_v47 = vmul.f32 1.442695, %v233_v24  ;;  %v1617_v14 = vld [vmem:[#allocation9 + $0x50] sm:$0xff] }
  0x64   :  { %1095 = vpow2.f32 %v300_v61  ;;  %v235_v5 = vmin.f32 %v1607_v34, 20.0  ;;  %v580_v55 = vmul.f32 2.0, %v548_v35  ;;  %v1027_v61 = vpack.c.bf16 %v1613_v49, %v1611_v6 }
  0x65   :  { %1097 = vlog2.f32 %v326_v15  ;;  %v581_v59 = vmul.f32 2.0, %v549_v40  ;;  %v274_v60 = vmul.f32 1.442695, %v234_v41  ;;  %v1619_v15 = vld [vmem:[#allocation9 + $0x58] sm:$0xff]  ;;  %vm439_vm11 = vcmp.gt.f32.partialorder %v1588_v9, 20.0 }
  0x66   :  { %1099 = vlog2.f32 %v327_v36  ;;  %v276_v0 = vmul.f32 1.442695, %v235_v5  ;;  %1028 = vmatprep.subr.bf16.mxu0 %v1027_v61  ;;  %v1029_v36 = vpack.c.bf16 %v1619_v15, %v1617_v14  ;;  %v1643_v40 = vld [vmem:[#allocation11 + $0xb8] sm:$0xff]  ;;  %vm427_vm15 = vcmp.gt.f32.partialorder %v1607_v34, 20.0 }
  0x67   :  { %v1082_v16 = vpop.eup %1081  ;;  %1101 = vlog2.f32 %v338_v29  ;;  %v1628_v29 = vmul.f32 %v1489_v3, %v1489_v3  ;;  %vm441_vm3 = vcmp.gt.f32.partialorder %v1643_v40, 20.0 }
  0x68   :  { %v1084_v26 = vpop.eup %1083  ;;  %v643_v31 = vmul.f32 0.6931472, %v1082_v16  ;;  %1103 = vlog2.f32 %v339_v17  ;;  %v1632_v17 = vmul.f32 %v1503_v10, %v1503_v10  ;;  %1030 = vmatpush3.bf16.msra.mxu0 %v1029_v36  ;;  %v1687_v36 = vmul.f32 %v1541_v38, %v1541_v38 }
  0x69   :  { %v645_v8 = vmul.f32 0.6931472, %v1084_v26  ;;  %v1086_v50 = vpop.eup %1085  ;;  %1105 = vpow2.f32 %v270_v37  ;;  %v1708_v38 = vmul.f32 %v1551_v44, %v1551_v44 }
  0x6a   :  { %v706_v18 = vsub.f32 %v578_v4, %v643_v31  ;;  %v1088_v51 = vpop.eup %1087  ;;  %1107 = vpow2.f32 %v272_v47  ;;  %v340_v20 = vadd.f32 1.0, %v1086_v50  ;;  %v1650_v50 = vld [vmem:[#allocation11 + $0xc0] sm:$0xff] }
  0x6b   :  { %v707_v45 = vsub.f32 %v579_v23, %v645_v8  ;;  %v1090_v58 = vpop.eup %1089  ;;  %v1623_v23 = vmul.f32 %v1487_v2, %v1487_v2  ;;  %v341_v24 = vadd.f32 1.0, %v1088_v51  ;;  %1109 = vpow2.f32 %v274_v60  ;;  %v1634_v8 = vld [vmem:[#allocation11 + $0xb0] sm:$0xff]  ;;  %2120 = vst [vmem:[#allocation19_spill] sm:$0xff] %v1708_v38 }
  0x6c   :  { %v1092_v19 = vpop.eup %1091  ;;  %v647_v63 = vmul.f32 0.6931472, %v1090_v58  ;;  %1111 = vpow2.f32 %v276_v0  ;;  %v248_v5 = vmin.f32 %v1634_v8, 20.0  ;;  %v518_v58 = vmul.f32 %v1529_v27, %v1529_v27 }
  0x6d   :  { %v739_v54 = vadd.f32 %v707_v45, %v706_v18  ;;  %v649_v1 = vmul.f32 0.6931472, %v1092_v19  ;;  %v1094_v4 = vpop.eup %1093  ;;  %1113 = vlog2.f32 %v340_v20  ;;  %v1647_v45 = vmul.f32 %v1507_v13, %v1507_v13 }
  0x6e   :  { %v708_v11 = vsub.f32 %v580_v55, %v647_v63  ;;  %v1096_v16 = vpop.eup %1095  ;;  %v342_v2 = vadd.f32 1.0, %v1094_v4  ;;  %1115 = vlog2.f32 %v341_v24  ;;  %v1658_v55 = vmul.f32 %v1521_v22, %v1521_v22 }
  0x6f   :  { %v709_v26 = vsub.f32 %v581_v59, %v649_v1  ;;  %v1098_v35 = vpop.eup %1097  ;;  %v343_v18 = vadd.f32 1.0, %v1096_v16  ;;  %v1665_v59 = vld [vmem:[#allocation11 + $0xc8] sm:$0xff]  ;;  %v249_v19 = vmin.f32 %v1643_v40, 20.0  ;;  %v519_v63 = vmul.f32 %v1531_v28, %v1531_v28 }
  0x70   :  { %v740_v31 = vadd.f32 %v739_v54, %v708_v11  ;;  %v1100_v3 = vpop.eup %1099  ;;  %v363_v10 = vmul.f32 0.6931472, %v1098_v35  ;;  %v1654_v54 = vmul.f32 %v1519_v21, %v1519_v21  ;;  %1117 = vlog2.f32 %v342_v2 }
  0x71   :  { %v1102_v41 = vpop.eup %1101  ;;  %v365_v47 = vmul.f32 0.6931472, %v1100_v3  ;;  %1119 = vlog2.f32 %v343_v18  ;;  %v250_v0 = vmin.f32 %v1650_v50, 20.0  ;;  %v302_v20 = vmul.f32 1.442695, %v248_v5  ;;  %v1712_v5 = vld [vmem:[#allocation9 + $0xe8] sm:$0xff] }
  0x72   :  { %v1640_v37 = vadd.f32 %v740_v31, %v709_v26  ;;  %v1104_v51 = vpop.eup %1103  ;;  %v454_v13 = vsel %vm422_vm6, %v1547_v42, %v363_v10  ;;  %v387_v27 = vmul.f32 0.6931472, %v1102_v41  ;;  %v251_v1 = vmin.f32 %v1665_v59, 20.0  ;;  %v1695_v10 = vld [vmem:[#allocation11 + $0x50] sm:$0xff]  ;;  %2122 = vst [vmem:[#allocation21_spill] sm:$0xff] %v1712_v5 }
  0x73   :  { %v1106_v60 = vpop.eup %1105  ;;  %v455_v21 = vsel %vm423_vm7, %v1557_v52, %v365_v47  ;;  %v614_v61 = vadd.f32 1e-07, %v454_v13  ;;  %v389_v4 = vmul.f32 0.6931472, %v1104_v51  ;;  %v486_v52 = vmul.f32 %v454_v13, %v454_v13 }
  0x74   :  { %v1108_v22 = vpop.eup %1107  ;;  %v615_v42 = vadd.f32 1e-07, %v455_v21  ;;  %v328_v11 = vadd.f32 1.0, %v1106_v60  ;;  %v487_v24 = vmul.f32 %v455_v21, %v455_v21  ;;  %v304_v26 = vmul.f32 1.442695, %v249_v19 }
  0x75   :  { %1121 = vlog2.f32 %v614_v61  ;;  %v1110_v16 = vpop.eup %1109  ;;  %v1679_v28 = vmul.f32 %v1535_v32, %v1535_v32  ;;  %v329_v31 = vadd.f32 1.0, %v1108_v22  ;;  %v1683_v2 = vmul.f32 %v1537_v33, %v1537_v33  ;;  %v1718_v61 = vld [vmem:[#allocation11 + $0x58] sm:$0xff] }
  0x76   :  { %1123 = vlog2.f32 %v615_v42  ;;  %v1112_v35 = vpop.eup %1111  ;;  %v1691_v3 = vmul.f32 %v1543_v39, %v1543_v39  ;;  %v1693_v18 = vmul.f32 1.442695, %v250_v0  ;;  %v466_v41 = vsel %vm434_vm4, %v1553_v46, %v387_v27  ;;  %v1710_v39 = vld [vmem:[#allocation9 + $0xe0] sm:$0xff]  ;;  %v1727_v42 = vld [vmem:[#allocation9 + $0x68] sm:$0xff] }
  0x77   :  { %2118 = vst [vmem:[#allocation17_spill] sm:$0xff] %v1683_v2  ;;  %v1114_v32 = vpop.eup %1113  ;;  %v1700_v47 = vmul.f32 1.442695, %v251_v1  ;;  %v1704_v33 = vmul.f32 %v1549_v43, %v1549_v43  ;;  %2121 = vst [vmem:[#allocation20_spill] sm:$0xff] %v1710_v39  ;;  %v467_v51 = vsel %vm435_vm5, %v1555_v48, %v389_v4  ;;  %v550_v13 = vadd.f32 %v518_v58, %v486_v52  ;;  %v1725_v58 = vld [vmem:[#allocation9 + $0x60] sm:$0xff] }
  0x78   :  { %1125 = vlog2.f32 %v328_v11  ;;  %v330_v46 = vadd.f32 1.0, %v1110_v16  ;;  %v1116_v60 = vpop.eup %1115  ;;  %v551_v43 = vadd.f32 %v519_v63, %v487_v24  ;;  %v331_v21 = vadd.f32 1.0, %v1112_v35  ;;  %v1730_v4 = vld [vmem:[#allocation11 + $0x60] sm:$0xff]  ;;  %v1733_v24 = vld [vmem:[#allocation11 + $0x68] sm:$0xff] }
  0x79   :  { %2119 = vst [vmem:[#allocation18_spill] sm:$0xff] %v1704_v33  ;;  %1127 = vlog2.f32 %v329_v31  ;;  %v236_v44 = vmin.f32 %v1695_v10, 20.0  ;;  %v626_v19 = vadd.f32 1e-07, %v466_v41  ;;  %v391_v22 = vmul.f32 0.6931472, %v1114_v32 }
  0x7a   :  { %1129 = vpow2.f32 %v302_v20  ;;  %v1031_v48 = vpack.c.bf16 %v1712_v5, %v1710_v39  ;;  %v1118_v63 = vpop.eup %1117  ;;  %v498_v0 = vmul.f32 %v466_v41, %v466_v41  ;;  %v499_v27 = vmul.f32 %v467_v51, %v467_v51 }
  0x7b   :  { %v627_v1 = vadd.f32 1e-07, %v467_v51  ;;  %1131 = vpow2.f32 %v304_v26  ;;  %v1120_v52 = vpop.eup %1119  ;;  %v393_v20 = vmul.f32 0.6931472, %v1116_v60  ;;  %v582_v11 = vmul.f32 2.0, %v550_v13 }
  0x7c   :  { %1133 = vlog2.f32 %v330_v46  ;;  %v237_v16 = vmin.f32 %v1718_v61, 20.0  ;;  %1032 = vmatprep.subr.bf16.mxu0 %v1031_v48  ;;  %v583_v35 = vmul.f32 2.0, %v551_v43  ;;  %v278_v32 = vmul.f32 1.442695, %v236_v44  ;;  %v1745_v44 = vld [vmem:[#allocation9 + $0xf8] sm:$0xff] }
  0x7d   :  { %1135 = vlog2.f32 %v331_v21  ;;  %v1033_v26 = vpack.c.bf16 %v1727_v42, %v1725_v58  ;;  %v468_v51 = vsel %vm436_vm8, %v1573_v7, %v391_v22  ;;  %v238_v46 = vmin.f32 %v1730_v4, 20.0  ;;  %v1743_v21 = vld [vmem:[#allocation9 + $0xf0] sm:$0xff] }
  0x7e   :  { %1137 = vlog2.f32 %v626_v19  ;;  %v562_v60 = vadd.f32 %v1623_v23, %v498_v0  ;;  %v239_v43 = vmin.f32 %v1733_v24, 20.0  ;;  %v469_v19 = vsel %vm437_vm9, %v1575_v12, %v393_v20 }
  0x7f   :  { %v1122_v31 = vpop.eup %1121  ;;  %1139 = vlog2.f32 %v627_v1  ;;  %1034 = vmatpush3.bf16.msra.mxu0 %v1033_v26  ;;  %v395_v5 = vmul.f32 0.6931472, %v1118_v63  ;;  %v280_v22 = vmul.f32 1.442695, %v237_v16  ;;  %v397_v39 = vmul.f32 0.6931472, %v1120_v52 }
  0x80   :  { %v1124_v41 = vpop.eup %1123  ;;  %v651_v13 = vmul.f32 0.6931472, %v1122_v31  ;;  %v628_v31 = vadd.f32 1e-07, %v468_v51  ;;  %1141 = vpow2.f32 %v278_v32  ;;  %v500_v0 = vmul.f32 %v468_v51, %v468_v51 }
  0x81   :  { %v653_v48 = vmul.f32 0.6931472, %v1124_v41  ;;  %v282_v26 = vmul.f32 1.442695, %v238_v46  ;;  %v1035_v41 = vpack.c.bf16 %v1745_v44, %v1743_v21  ;;  %v563_v49 = vadd.f32 %v1628_v29, %v499_v27 }
  0x82   :  { %v710_v7 = vsub.f32 %v582_v11, %v651_v13  ;;  %v1126_v23 = vpop.eup %1125  ;;  %v501_v2 = vmul.f32 %v469_v19, %v469_v19  ;;  %v284_v63 = vmul.f32 1.442695, %v239_v43  ;;  %v1757_v52 = vsel %vm438_vm10, %v1581_v30, %v395_v5 }
  0x83   :  { %v711_v38 = vsub.f32 %v583_v35, %v653_v48  ;;  %v1128_v33 = vpop.eup %1127  ;;  %v367_v12 = vmul.f32 0.6931472, %v1126_v23  ;;  %1143 = vpow2.f32 %v280_v22  ;;  %1036 = vmatprep.subr.bf16.mxu0 %v1035_v41  ;;  %v629_v35 = vadd.f32 1e-07, %v469_v19  ;;  %v1785_v23 = vld [vmem:[#allocation11 + $0xd0] sm:$0xff] }
  0x84   :  { %v742_v1 = vadd.f32 %v1640_v37, %v710_v7  ;;  %v1130_v20 = vpop.eup %1129  ;;  %v369_v16 = vmul.f32 0.6931472, %v1128_v33  ;;  %1145 = vlog2.f32 %v628_v31  ;;  %v1764_v29 = vsel %vm439_vm11, %v1588_v9, %v397_v39 }
  0x85   :  { %v1132_v37 = vpop.eup %1131  ;;  %v456_v27 = vsel %vm424_vm12, %v1595_v53, %v367_v12  ;;  %v564_v30 = vadd.f32 %v1632_v17, %v500_v0  ;;  %1147 = vpow2.f32 %v282_v26  ;;  %v630_v51 = vadd.f32 1e-07, %v1757_v52  ;;  %v1792_v26 = vld [vmem:[#allocation11 + $0xd8] sm:$0xff] }
  0x86   :  { %v1759_v11 = vadd.f32 %v742_v1, %v711_v38  ;;  %v1134_v32 = vpop.eup %1133  ;;  %v457_v33 = vsel %vm425_vm13, %v1597_v62, %v369_v16  ;;  %v616_v38 = vadd.f32 1e-07, %v456_v27  ;;  %1149 = vpow2.f32 %v284_v63 }
  0x87   :  { %v1136_v5 = vpop.eup %1135  ;;  %v617_v13 = vadd.f32 1e-07, %v457_v33  ;;  %v371_v46 = vmul.f32 0.6931472, %v1134_v32  ;;  %v565_v39 = vadd.f32 %v1647_v45, %v501_v2  ;;  %v631_v53 = vadd.f32 1e-07, %v1764_v29 }
  0x88   :  { %v1138_v9 = vpop.eup %1137  ;;  %1151 = vlog2.f32 %v616_v38  ;;  %v344_v48 = vadd.f32 1.0, %v1130_v20  ;;  %v488_v43 = vmul.f32 %v456_v27, %v456_v27  ;;  %v1778_v62 = vmul.f32 2.0, %v562_v60 }
  0x89   :  { %v1140_v17 = vpop.eup %1139  ;;  %1153 = vlog2.f32 %v617_v13  ;;  %v489_v19 = vmul.f32 %v457_v33, %v457_v33  ;;  %v373_v7 = vmul.f32 0.6931472, %v1136_v5  ;;  %v1780_v31 = vmul.f32 2.0, %v563_v49  ;;  %v1808_v13 = vld [vmem:[#allocation9 + $0x70] sm:$0xff] }
  0x8a   :  { %1155 = vlog2.f32 %v629_v35  ;;  %v1142_v22 = vpop.eup %1141  ;;  %v1782_v45 = vmul.f32 2.0, %v564_v30  ;;  %v458_v2 = vsel %vm426_vm14, %v1605_v25, %v371_v46  ;;  %v1787_v0 = vmul.f32 0.6931472, %v1138_v9 }
  0x8b   :  { %1157 = vlog2.f32 %v630_v51  ;;  %v1789_v1 = vmul.f32 2.0, %v565_v39  ;;  %v459_v60 = vsel %vm427_vm15, %v1607_v34, %v373_v7  ;;  %v552_v49 = vadd.f32 %v1687_v36, %v488_v43 }
  0x8c   :  { %1159 = vlog2.f32 %v631_v53  ;;  %v618_v41 = vadd.f32 1e-07, %v458_v2  ;;  %v619_v12 = vadd.f32 1e-07, %v459_v60  ;;  %v553_v20 = vadd.f32 %v1691_v3, %v489_v19 }
  0x8d   :  { %1161 = vlog2.f32 %v344_v48  ;;  %v1144_v63 = vpop.eup %1143  ;;  %v252_v25 = vmin.f32 %v1785_v23, 20.0  ;;  %v332_v16 = vadd.f32 1.0, %v1142_v22  ;;  %v1800_v27 = vmul.f32 0.6931472, %v1140_v17  ;;  %v1816_v48 = vld [vmem:[#allocation11 + $0x70] sm:$0xff] }
  0x8e   :  { %1163 = vpow2.f32 %v1693_v18  ;;  %v1798_v35 = vpop.eup %1145  ;;  %v345_v34 = vadd.f32 1.0, %v1132_v37  ;;  %v253_v32 = vmin.f32 %v1792_v26, 20.0  ;;  %v490_v36 = vmul.f32 %v458_v2, %v458_v2  ;;  %v1810_v37 = vld [vmem:[#allocation9 + $0x78] sm:$0xff] }
  0x8f   :  { %1165 = vlog2.f32 %v618_v41  ;;  %v1148_v30 = vpop.eup %1147  ;;  %v522_v33 = vmul.f32 %v1563_v56, %v1563_v56  ;;  %v523_v3 = vmul.f32 %v1565_v57, %v1565_v57  ;;  %v584_v38 = vmul.f32 2.0, %v552_v49  ;;  %v1822_v2 = vld [vmem:[#allocation11 + $0x78] sm:$0xff] }
  0x90   :  { %1167 = vlog2.f32 %v619_v12  ;;  %v1150_v18 = vpop.eup %1149  ;;  %v491_v5 = vmul.f32 %v459_v60, %v459_v60  ;;  %v333_v51 = vadd.f32 1.0, %v1144_v63  ;;  %v502_v9 = vmul.f32 %v1757_v52, %v1757_v52 }
  0x91   :  { %1169 = vpow2.f32 %v1700_v47  ;;  %v585_v39 = vmul.f32 2.0, %v553_v20  ;;  %v310_v56 = vmul.f32 1.442695, %v252_v25  ;;  %v503_v57 = vmul.f32 %v1764_v29, %v1764_v29 }
  0x92   :  { %v1152_v46 = vpop.eup %1151  ;;  %1171 = vlog2.f32 %v332_v16  ;;  %v312_v47 = vmul.f32 1.442695, %v253_v32  ;;  %v554_v7 = vadd.f32 %v522_v33, %v490_v36  ;;  %v334_v22 = vadd.f32 1.0, %v1148_v30  ;;  %v87_v16 = vld [vmem:[#allocation6] sm:$0xff] }
  0x93   :  { %v1154_v53 = vpop.eup %1153  ;;  %1173 = vlog2.f32 %v345_v34  ;;  %v655_v17 = vmul.f32 0.6931472, %v1152_v46  ;;  %v1037_v52 = vpack.c.bf16 %v1810_v37, %v1808_v13  ;;  %v555_v41 = vadd.f32 %v523_v3, %v491_v5 }
  0x94   :  { %v1818_v43 = vpop.eup %1155  ;;  %v657_v19 = vmul.f32 0.6931472, %v1154_v53  ;;  %1175 = vlog2.f32 %v333_v51  ;;  %v335_v29 = vadd.f32 1.0, %v1150_v18  ;;  %v566_v63 = vadd.f32 %v1654_v54, %v502_v9  ;;  %v1841_v9 = vld [vmem:[#allocation11 + $0xe0] sm:$0xff] }
  0x95   :  { %v1824_v60 = vpop.eup %1157  ;;  %v712_v49 = vsub.f32 %v584_v38, %v655_v17  ;;  %1177 = vpow2.f32 %v310_v56  ;;  %1038 = vmatpush3.bf16.msra.mxu0 %v1037_v52  ;;  %v240_v25 = vmin.f32 %v1816_v48, 20.0  ;;  %v722_v32 = vsub.f32 %v1778_v62, %v1787_v0  ;;  %v1839_v38 = vld [vmem:[%s2106_s4] sm:$0x1] }
  0x96   :  { %v1826_v12 = vpop.eup %1159  ;;  %v713_v20 = vsub.f32 %v585_v39, %v657_v19  ;;  %1179 = vpow2.f32 %v312_v47  ;;  %v241_v36 = vmin.f32 %v1822_v2, 20.0  ;;  %v723_v3 = vsub.f32 %v1780_v31, %v1800_v27  ;;  %v1846_v47 = vld [vmem:[#allocation11 + $0xe8] sm:$0xff]  ;;  %v2126_v27 = vld [vmem:[#allocation19_spill] sm:$0xff] }
  0x97   :  { %v1162_v34 = vpop.eup %1161  ;;  %v744_v30 = vadd.f32 %v1759_v11, %v712_v49  ;;  %v586_v54 = vmul.f32 2.0, %v554_v7  ;;  %1181 = vlog2.f32 %v334_v22  ;;  %v286_v18 = vmul.f32 1.442695, %v240_v25  ;;  %v1851_v19 = vld [vmem:[%s2108_s6] sm:$0x1] }
  0x98   :  { %v1164_v33 = vpop.eup %1163  ;;  %v587_v46 = vmul.f32 2.0, %v555_v41  ;;  %1183 = vlog2.f32 %v335_v29  ;;  %v288_v11 = vmul.f32 1.442695, %v241_v36  ;;  %187 = vmatmul.mubr.f32.vlgmr.msra.gmra.mrb[0].mxu0 %v87_v16  ;;  %v567_v56 = vadd.f32 %v1658_v55, %v503_v57 }
  0x99   :  { %v1166_v5 = vpop.eup %1165  ;;  %v745_v51 = vadd.f32 %v744_v30, %v713_v20  ;;  %v1844_v53 = vmul.f32 2.0, %v566_v63  ;;  %1185 = vpow2.f32 %v286_v18  ;;  %v1854_v22 = vmul.f32 0.6931472, %v1798_v35 }
  0x9a   :  { %v1168_v39 = vpop.eup %1167  ;;  %v659_v17 = vmul.f32 0.6931472, %v1166_v5  ;;  %vm428_vm0 = vcmp.gt.f32.partialorder %v1695_v10, 20.0  ;;  %v786_v55 = vmin.f32 %v1839_v38, 20.0  ;;  %vm440_vm1 = vcmp.gt.f32.partialorder %v1634_v8, 20.0 }
  0x9b   :  { %v1170_v7 = vpop.eup %1169  ;;  %v661_v52 = vmul.f32 0.6931472, %v1168_v39  ;;  %v346_v49 = vadd.f32 1.0, %v1164_v33  ;;  %v254_v29 = vmin.f32 %v1841_v9, 20.0  ;;  %1187 = vpow2.f32 %v288_v11 }
  0x9c   :  { %v1172_v57 = vpop.eup %1171  ;;  %v714_v41 = vsub.f32 %v586_v54, %v659_v17  ;;  %v787_v16 = vmul.f32 1.442695, %v786_v55  ;;  %v795_v35 = vmin.f32 %v1851_v19, 20.0  ;;  %v1861_v30 = vmul.f32 2.0, %v567_v56 }
  0x9d   :  { %v1174_v63 = vpop.eup %1173  ;;  %v715_v20 = vsub.f32 %v587_v46, %v661_v52  ;;  %v375_v25 = vmul.f32 0.6931472, %v1172_v57  ;;  %v347_v36 = vadd.f32 1.0, %v1170_v7  ;;  %v255_v5 = vmin.f32 %v1846_v47, 20.0 }
  0x9e   :  { %v746_v18 = vadd.f32 %v745_v51, %v714_v41  ;;  %v1176_v39 = vpop.eup %1175  ;;  %vm429_vm2 = vcmp.gt.f32.partialorder %v1718_v61, 20.0  ;;  %1189 = vpow2.f32 %v787_v16  ;;  %v796_v54 = vmul.f32 1.442695, %v795_v35 }
  0x9f   :  { %v460_v33 = vsel %vm428_vm0, %v1695_v10, %v375_v25  ;;  %v1178_v46 = vpop.eup %1177  ;;  %1191 = vlog2.f32 %v346_v49  ;;  %v377_v17 = vmul.f32 0.6931472, %v1176_v39  ;;  %v314_v56 = vmul.f32 1.442695, %v254_v29 }
  0xa0   :  { %v1868_v11 = vadd.f32 %v746_v18, %v715_v20  ;;  %v1180_v52 = vpop.eup %1179  ;;  %v1871_v51 = vmul.f32 0.6931472, %v1818_v43  ;;  %v620_v55 = vadd.f32 1e-07, %v460_v33  ;;  %1193 = vpow2.f32 %v796_v54 }
  0xa1   :  { %v1182_v57 = vpop.eup %1181  ;;  %v399_v41 = vmul.f32 0.6931472, %v1162_v34  ;;  %1195 = vlog2.f32 %v347_v36  ;;  %v461_v10 = vsel %vm429_vm2, %v1718_v61, %v377_v17  ;;  %v316_v49 = vmul.f32 1.442695, %v255_v5 }
  0xa2   :  { %v1184_v20 = vpop.eup %1183  ;;  %v492_v25 = vmul.f32 %v460_v33, %v460_v33  ;;  %v524_v29 = vmul.f32 %v1617_v14, %v1617_v14  ;;  %v621_v43 = vadd.f32 1e-07, %v461_v10  ;;  %1197 = vlog2.f32 %v620_v55  ;;  %v778_v14 = vld [vmem:[%s2110_s9] sm:$0x1] }
  0xa3   :  { %v1186_v16 = vpop.eup %1185  ;;  %v348_v35 = vadd.f32 1.0, %v1178_v46  ;;  %v349_v18 = vadd.f32 1.0, %v1180_v52  ;;  %v525_v34 = vmul.f32 %v1619_v15, %v1619_v15  ;;  %1199 = vpow2.f32 %v314_v56  ;;  %v1893_v56 = vld [vmem:[#allocation11 + $0xf0] sm:$0xff] }
  0xa4   :  { %v493_v36 = vmul.f32 %v461_v10, %v461_v10  ;;  %1201 = vlog2.f32 %v621_v43  ;;  %vm430_vm4 = vcmp.gt.f32.partialorder %v1730_v4, 20.0  ;;  %vm431_vm5 = vcmp.gt.f32.partialorder %v1733_v24, 20.0  ;;  %v1897_v43 = vld [vmem:[#allocation11 + $0xf8] sm:$0xff] }
  0xa5   :  { %v1188_v61 = vpop.eup %1187  ;;  %1203 = vpow2.f32 %v316_v49  ;;  %v379_v39 = vmul.f32 0.6931472, %v1182_v57  ;;  %v381_v33 = vmul.f32 0.6931472, %v1184_v20  ;;  %v401_v54 = vmul.f32 0.6931472, %v1174_v63 }
  0xa6   :  { %v472_v15 = vsel %vm440_vm1, %v1634_v8, %v399_v41  ;;  %v556_v46 = vadd.f32 %v524_v29, %v492_v25  ;;  %v336_v17 = vadd.f32 1.0, %v1186_v16  ;;  %1205 = vlog2.f32 %v348_v35 }
  0xa7   :  { %v462_v52 = vsel %vm430_vm4, %v1730_v4, %v379_v39  ;;  %v463_v55 = vsel %vm431_vm5, %v1733_v24, %v381_v33  ;;  %v779_v10 = vsub.f32 0.0, %v778_v14  ;;  %1207 = vlog2.f32 %v349_v18 }
  0xa8   :  { %v1190_v49 = vpop.eup %1189  ;;  %v557_v57 = vadd.f32 %v525_v34, %v493_v36  ;;  %v622_v63 = vadd.f32 1e-07, %v462_v52  ;;  %v337_v20 = vadd.f32 1.0, %v1188_v61  ;;  %v623_v7 = vadd.f32 1e-07, %v463_v55 }
  0xa9   :  { %v1192_v5 = vpop.eup %1191  ;;  %1209 = vlog2.f32 %v336_v17  ;;  %v789_v8 = vadd.f32 1.0, %v1190_v49  ;;  %v256_v41 = vmin.f32 %v1893_v56, 20.0  ;;  %vm442_vm6 = vcmp.gt.f32.partialorder %v1650_v50, 20.0 }
  0xaa   :  { %v1194_v25 = vpop.eup %1193  ;;  %vm443_vm7 = vcmp.gt.f32.partialorder %v1665_v59, 20.0  ;;  %v588_v4 = vmul.f32 2.0, %v556_v46  ;;  %v526_v24 = vmul.f32 %v1725_v58, %v1725_v58  ;;  %1211 = vlog2.f32 %v622_v63 }
  0xab   :  { %v257_v29 = vmin.f32 %v1897_v43, 20.0  ;;  %v1196_v16 = vpop.eup %1195  ;;  %v494_v35 = vmul.f32 %v462_v52, %v462_v52  ;;  %1213 = vlog2.f32 %v623_v7  ;;  %v798_v18 = vadd.f32 1.0, %v1194_v25 }
  0xac   :  { %v780_v34 = vmul.f32 1.442695, %v779_v10  ;;  %v1198_v36 = vpop.eup %1197  ;;  %v495_v14 = vmul.f32 %v463_v55, %v463_v55  ;;  %v527_v61 = vmul.f32 %v1727_v42, %v1727_v42  ;;  %1215 = vlog2.f32 %v337_v20 }
  0xad   :  { %v318_v39 = vmul.f32 1.442695, %v256_v41  ;;  %v1200_v33 = vpop.eup %1199  ;;  %v589_v46 = vmul.f32 2.0, %v557_v57  ;;  %v663_v17 = vmul.f32 0.6931472, %v1198_v36  ;;  %1217 = vlog2.f32 %v789_v8 }
  0xae   :  { %v320_v58 = vmul.f32 1.442695, %v257_v29  ;;  %v1202_v49 = vpop.eup %1201  ;;  %v473_v52 = vsel %vm441_vm3, %v1643_v40, %v401_v54  ;;  %v632_v7 = vadd.f32 1e-07, %v472_v15  ;;  %v1912_v10 = vmul.f32 %v1611_v6, %v1611_v6 }
  0xaf   :  { %1219 = vlog2.f32 %v798_v18  ;;  %v1204_v55 = vpop.eup %1203  ;;  %v665_v42 = vmul.f32 0.6931472, %v1202_v49  ;;  %v716_v63 = vsub.f32 %v588_v4, %v663_v17  ;;  %v558_v20 = vadd.f32 %v526_v24, %v494_v35 }
  0xb0   :  { %1221 = vpow2.f32 %v780_v34  ;;  %v403_v57 = vmul.f32 0.6931472, %v1192_v5  ;;  %v405_v41 = vmul.f32 0.6931472, %v1196_v16  ;;  %v559_v8 = vadd.f32 %v527_v61, %v495_v14  ;;  %v1206_v25 = vpop.eup %1205 }
  0xb1   :  { %1223 = vpow2.f32 %v318_v39  ;;  %v717_v29 = vsub.f32 %v589_v46, %v665_v42  ;;  %v748_v36 = vadd.f32 %v1868_v11, %v716_v63  ;;  %v350_v40 = vadd.f32 1.0, %v1200_v33  ;;  %v1208_v54 = vpop.eup %1207 }
  0xb2   :  { %1225 = vpow2.f32 %v320_v58  ;;  %v1916_v6 = vmul.f32 0.6931472, %v1824_v60  ;;  %v1919_v18 = vmul.f32 0.6931472, %v1826_v12  ;;  %v1921_v4 = vmul.f32 %v472_v15, %v472_v15 }
  0xb3   :  { %v351_v24 = vadd.f32 1.0, %v1204_v55  ;;  %v1210_v5 = vpop.eup %1209  ;;  %v1923_v16 = vmul.f32 %v473_v52, %v473_v52  ;;  %v749_v35 = vadd.f32 %v748_v36, %v717_v29  ;;  %v590_v34 = vmul.f32 2.0, %v558_v20 }
  0xb4   :  { %vm432_vm8 = vcmp.gt.f32.partialorder %v1816_v48, 20.0  ;;  %v1212_v11 = vpop.eup %1211  ;;  %v1926_v14 = vadd.f32 1e-07, %v473_v52  ;;  %1227 = vlog2.f32 %v632_v7  ;;  %vm444_vm9 = vcmp.gt.f32.partialorder %v1785_v23, 20.0 }
  0xb5   :  { %v591_v60 = vmul.f32 2.0, %v559_v8  ;;  %v383_v61 = vmul.f32 0.6931472, %v1210_v5  ;;  %v1214_v12 = vpop.eup %1213  ;;  %v1932_v15 = vsel %vm442_vm6, %v1650_v50, %v403_v57  ;;  %v1937_v39 = vsel %vm443_vm7, %v1665_v59, %v405_v41 }
  0xb6   :  { %vm445_vm10 = vcmp.gt.f32.partialorder %v1792_v26, 20.0  ;;  %1229 = vlog2.f32 %v350_v40  ;;  %v667_v33 = vmul.f32 0.6931472, %v1212_v11  ;;  %v1216_v46 = vpop.eup %1215  ;;  %v669_v17 = vmul.f32 0.6931472, %v1214_v12 }
  0xb7   :  { %1231 = vlog2.f32 %v351_v24  ;;  %vm433_vm11 = vcmp.gt.f32.partialorder %v1822_v2, 20.0  ;;  %v464_v58 = vsel %vm432_vm8, %v1816_v48, %v383_v61  ;;  %v1218_v50 = vpop.eup %1217  ;;  %v385_v52 = vmul.f32 0.6931472, %v1216_v46  ;;  %v1952_v48 = vld [vmem:[%s2105_s3] sm:$0x1] }
  0xb8   :  { %v718_v49 = vsub.f32 %v590_v34, %v667_v33  ;;  %v624_v7 = vadd.f32 1e-07, %v464_v58  ;;  %vm792_vm12 = vcmp.gt.f32.partialorder %v1839_v38, 20.0  ;;  %v719_v55 = vsub.f32 %v591_v60, %v669_v17 }
  0xb9   :  { %v1220_v59 = vpop.eup %1219  ;;  %v528_v42 = vmul.f32 %v1808_v13, %v1808_v13  ;;  %v791_v63 = vmul.f32 0.6931472, %v1218_v50  ;;  %vm801_vm13 = vcmp.gt.f32.partialorder %v1851_v19, 20.0  ;;  %v465_v41 = vsel %vm433_vm11, %v1822_v2, %v385_v52 }
  0xba   :  { %v1222_v20 = vpop.eup %1221  ;;  %v750_v57 = vadd.f32 %v749_v35, %v718_v49  ;;  %v496_v8 = vmul.f32 %v464_v58, %v464_v58  ;;  %1233 = vlog2.f32 %v624_v7  ;;  %v407_v36 = vmul.f32 0.6931472, %v1206_v25 }
  0xbb   :  { %v1224_v29 = vpop.eup %1223  ;;  %v625_v40 = vadd.f32 1e-07, %v465_v41  ;;  %v793_v24 = vsel %vm792_vm12, %v1839_v38, %v791_v63  ;;  %v800_v13 = vmul.f32 0.6931472, %v1220_v59  ;;  %v409_v34 = vmul.f32 0.6931472, %v1208_v54 }
  0xbc   :  { %v1226_v5 = vpop.eup %1225  ;;  %v751_v11 = vadd.f32 %v750_v57, %v719_v55  ;;  %v529_v35 = vmul.f32 %v1810_v37, %v1810_v37  ;;  %v854_v2 = vadd.f32 1e-07, %v793_v24  ;;  %v851_v60 = vmul.f32 %v1952_v48, %v1952_v48  ;;  %v1965_v38 = vld [vmem:[%s2107_s5] sm:$0x1] }
  0xbd   :  { %1235 = vlog2.f32 %v625_v40  ;;  %v802_v61 = vsel %vm801_vm13, %v1851_v19, %v800_v13  ;;  %v782_v25 = vadd.f32 1.0, %v1222_v20  ;;  %v497_v12 = vmul.f32 %v465_v41, %v465_v41 }
  0xbe   :  { %v560_v33 = vadd.f32 %v528_v42, %v496_v8  ;;  %1237 = vlog2.f32 %v854_v2  ;;  %v874_v54 = vadd.f32 1e-07, %v802_v61  ;;  %v1967_v37 = vpop.eup %1227  ;;  %v850_v46 = vmul.f32 %v793_v24, %v793_v24 }
  0xbf   :  { %1239 = vrcp.f32 %v782_v25  ;;  %v352_v17 = vadd.f32 1.0, %v1224_v29  ;;  %v353_v58 = vadd.f32 1.0, %v1226_v5  ;;  %v568_v19 = vadd.f32 %v1679_v28, %v1921_v4  ;;  %v2123_v28 = vld [vmem:[#allocation17_spill] sm:$0xff]  ;;  %v2124_v29 = vld [vmem:[#allocation16_spill] sm:$0xff] }
  0xc0   :  { %v1230_v50 = vpop.eup %1229  ;;  %v634_v49 = vadd.f32 1e-07, %v1932_v15  ;;  %v1975_v52 = vsel %vm444_vm9, %v1785_v23, %v407_v36  ;;  %1241 = vlog2.f32 %v874_v54  ;;  %v1980_v59 = vsel %vm445_vm10, %v1792_v26, %v409_v34 }
  0xc1   :  { %v1232_v7 = vpop.eup %1231  ;;  %v870_v55 = vmul.f32 %v802_v61, %v802_v61  ;;  %v871_v42 = vmul.f32 %v1965_v38, %v1965_v38  ;;  %1243 = vlog2.f32 %v352_v17  ;;  %v569_v4 = vadd.f32 %v2123_v28, %v1923_v16 }
  0xc2   :  { %v635_v63 = vadd.f32 1e-07, %v1937_v39  ;;  %v561_v20 = vadd.f32 %v529_v35, %v497_v12  ;;  %1245 = vlog2.f32 %v353_v58  ;;  %v636_v23 = vadd.f32 1e-07, %v1975_v52 }
  0xc3   :  { %1247 = vlog2.f32 %v1926_v14  ;;  %v592_v57 = vmul.f32 2.0, %v560_v33  ;;  %v852_v41 = vadd.f32 %v851_v60, %v850_v46  ;;  %v1989_v8 = vmul.f32 2.0, %v568_v19 }
  0xc4   :  { %v1234_v26 = vpop.eup %1233  ;;  %v1993_v36 = vmul.f32 %v2124_v29, %v2124_v29  ;;  %v637_v40 = vadd.f32 1e-07, %v1980_v59  ;;  %v411_v16 = vmul.f32 0.6931472, %v1230_v50  ;;  %1249 = vlog2.f32 %v634_v49 }
  0xc5   :  { %vm446_vm14 = vcmp.gt.f32.partialorder %v1841_v9, 20.0  ;;  %v671_v24 = vmul.f32 0.6931472, %v1234_v26  ;;  %v872_v13 = vadd.f32 %v871_v42, %v870_v55  ;;  %v1997_v14 = vmul.f32 2.0, %v569_v4 }
  0xc6   :  { %1251 = vlog2.f32 %v635_v63  ;;  %v413_v5 = vmul.f32 0.6931472, %v1232_v7  ;;  %v593_v34 = vmul.f32 2.0, %v561_v20  ;;  %vm447_vm15 = vcmp.gt.f32.partialorder %v1846_v47, 20.0 }
  0xc7   :  { %v1236_v35 = vpop.eup %1235  ;;  %1253 = vlog2.f32 %v636_v23  ;;  %v720_v2 = vsub.f32 %v592_v57, %v671_v24  ;;  %v853_v60 = vmul.f32 2.0, %v852_v41  ;;  %v506_v25 = vmul.f32 %v1932_v15, %v1932_v15 }
  0xc8   :  { %v1238_v61 = vpop.eup %1237  ;;  %1255 = vlog2.f32 %v637_v40  ;;  %v2003_v12 = vsel %vm446_vm14, %v1841_v9, %v411_v16  ;;  %v673_v33 = vmul.f32 0.6931472, %v1236_v35  ;;  %vm859_vm0 = vcmask 1040384  }
  0xc9   :  { %v2005_v54 = vpop.eup %1239  ;;  %v752_v46 = vadd.f32 %v751_v11, %v720_v2  ;;  %v856_v17 = vmul.f32 0.6931472, %v1238_v61  ;;  %v873_v58 = vmul.f32 2.0, %v872_v13  ;;  %v2008_v19 = vsel %vm447_vm15, %v1846_v47, %v413_v5 }
  0xca   :  { %v1242_v50 = vpop.eup %1241  ;;  %v721_v49 = vsub.f32 %v593_v34, %v673_v33  ;;  %v902_v7 = vadd.f32 1e-07, %v2005_v54  ;;  %v2012_v15 = vsub.f32 1.0, %v2005_v54  ;;  %v638_v9 = vadd.f32 1e-07, %v2003_v12 }
  0xcb   :  { %v1244_v55 = vpop.eup %1243  ;;  %v857_v42 = vsub.f32 %v853_v60, %v856_v17  ;;  %v876_v28 = vmul.f32 0.6931472, %v1242_v50  ;;  %vm448_vm1 = vcmp.gt.f32.partialorder %v1893_v56, 20.0  ;;  %vm449_vm2 = vcmp.gt.f32.partialorder %v1897_v43, 20.0 }
  0xcc   :  { %v1246_v11 = vpop.eup %1245  ;;  %v753_v4 = vadd.f32 %v752_v46, %v721_v49  ;;  %1257 = vlog2.f32 %v902_v7  ;;  %v907_v63 = vadd.f32 1e-07, %v2012_v15  ;;  %v415_v57 = vmul.f32 0.6931472, %v1244_v55  ;;  %v2128_v49 = vld [vmem:[#allocation20_spill] sm:$0xff] }
  0xcd   :  { %v1248_v47 = vpop.eup %1247  ;;  %v858_v20 = vadd.f32 -1.1931472, %v857_v42  ;;  %v877_v23 = vsub.f32 %v873_v58, %v876_v28  ;;  %v417_v41 = vmul.f32 0.6931472, %v1246_v11  ;;  %v507_v26 = vmul.f32 %v1937_v39, %v1937_v39 }
  0xce   :  { %v508_v29 = vmul.f32 %v1975_v52, %v1975_v52  ;;  %v754_v40 = vadd.f32 %v753_v4, %v722_v32  ;;  %1259 = vlog2.f32 %v907_v63  ;;  %v1250_v16 = vpop.eup %1249  ;;  %v639_v24 = vadd.f32 1e-07, %v2008_v19  ;;  %v2125_v52 = vld [vmem:[#allocation18_spill] sm:$0xff] }
  0xcf   :  { %v860_v13 = vsel %vm859_vm0, %v858_v20, 0.0  ;;  %v878_v5 = vadd.f32 -1.1931472, %v877_v23  ;;  %v480_v34 = vsel %vm448_vm1, %v1893_v56, %v415_v57  ;;  %v687_v39 = vmul.f32 0.6931472, %v1967_v37 }
  0xd0   :  { %v1252_v35 = vpop.eup %1251  ;;  %v689_v2 = vmul.f32 0.6931472, %v1248_v47  ;;  %v755_v62 = vadd.f32 %v754_v40, %v723_v3  ;;  %861 = vadd.xlane.f32.xlu0 %v860_v13  ;;  %v481_v0 = vsel %vm449_vm2, %v1897_v43, %v417_v41  ;;  %v570_v60 = vadd.f32 %v2125_v52, %v506_v25 }
  0xd1   :  { %v1254_v32 = vpop.eup %1253  ;;  %1261 = vlog2.f32 %v638_v9  ;;  %v879_v61 = vsel %vm859_vm0, %v878_v5, 0.0  ;;  %v640_v56 = vadd.f32 1e-07, %v480_v34  ;;  %v726_v37 = vsub.f32 %v1844_v53, %v1916_v6  ;;  %v2129_v6 = vld [vmem:[#allocation21_spill] sm:$0xff] }
  0xd2   :  { %v1256_v33 = vpop.eup %1255  ;;  %v727_v31 = vsub.f32 %v1861_v30, %v1919_v18  ;;  %v571_v3 = vadd.f32 %v2126_v27, %v507_v26  ;;  %v2127_v46 = vsub.f32 %v1782_v45, %v1854_v22  ;;  %v509_v25 = vmul.f32 %v1980_v59, %v1980_v59 }
  0xd3   :  { %v572_v17 = vadd.f32 %v1912_v10, %v508_v29  ;;  %v641_v58 = vadd.f32 1e-07, %v481_v0  ;;  %1263 = vlog2.f32 %v639_v24  ;;  %v728_v50 = vsub.f32 %v1989_v8, %v687_v39 }
  0xd4   :  { %v756_v43 = vadd.f32 %v755_v62, %v2127_v46  ;;  %v542_v53 = vmul.f32 %v2128_v49, %v2128_v49  ;;  %v543_v30 = vmul.f32 %v2129_v6, %v2129_v6  ;;  %v2130_v18 = vsub.f32 %v1789_v1, %v1871_v51  ;;  %880 = vadd.xlane.f32.xlu0 %v879_v61 }
  0xd5   :  { %v729_v22 = vsub.f32 %v1997_v14, %v689_v2  ;;  %v602_v59 = vmul.f32 2.0, %v570_v60  ;;  %v544_v10 = vmul.f32 %v1743_v21, %v1743_v21  ;;  %1265 = vlog2.f32 %v640_v56 }
  0xd6   :  { %v757_v45 = vadd.f32 %v756_v43, %v2130_v18  ;;  %v1258_v7 = vpop.eup %1257  ;;  %v603_v8 = vmul.f32 2.0, %v571_v3  ;;  %v691_v55 = vmul.f32 0.6931472, %v1250_v16  ;;  %v510_v9 = vmul.f32 %v2003_v12, %v2003_v12 }
  0xd7   :  { %v573_v28 = vadd.f32 %v1993_v36, %v509_v25  ;;  %v604_v11 = vmul.f32 2.0, %v572_v17  ;;  %v904_v1 = vmul.f32 0.6931472, %v1258_v7  ;;  %1267 = vlog2.f32 %v641_v58  ;;  %v803_v7 = vld [vmem:[#allocation5] sm:$0x1] }
  0xd8   :  { %v758_v42 = vadd.f32 %v757_v45, %v726_v37  ;;  %v1260_v51 = vpop.eup %1259  ;;  %v693_v4 = vmul.f32 0.6931472, %v1252_v35  ;;  %v695_v14 = vmul.f32 0.6931472, %v1254_v32  ;;  %v511_v63 = vmul.f32 %v2008_v19, %v2008_v19 }
  0xd9   :  { %v905_v47 = vmul.f32 %v2005_v54, %v904_v1  ;;  %v909_v20 = vmul.f32 0.6931472, %v1260_v51  ;;  %v923_v23 = vmul.f32 -2.3025842, %v2005_v54  ;;  %v924_v12 = vmul.f32 -0.1053604, %v2012_v15 }
  0xda   :  { %v759_v21 = vadd.f32 %v758_v42, %v727_v31  ;;  %v730_v57 = vsub.f32 %v602_v59, %v691_v55  ;;  %v574_v41 = vadd.f32 %v542_v53, %v510_v9  ;;  %v512_v36 = vmul.f32 %v480_v34, %v480_v34 }
  0xdb   :  { %v1262_v29 = vpop.eup %1261  ;;  %v605_v40 = vmul.f32 2.0, %v573_v28  ;;  %v697_v16 = vmul.f32 0.6931472, %v1256_v33  ;;  %v545_v24 = vmul.f32 %v1745_v44, %v1745_v44  ;;  %v910_v19 = vmul.f32 %v909_v20, %v2012_v15 }
  0xdc   :  { %v760_v26 = vadd.f32 %v759_v21, %v728_v50  ;;  %v731_v13 = vsub.f32 %v603_v8, %v693_v4  ;;  %v575_v5 = vadd.f32 %v543_v30, %v511_v63  ;;  %v513_v35 = vmul.f32 %v481_v0, %v481_v0  ;;  %v2074_v4 = vld [vmem:[#allocation4] sm:$0x1] }
  0xdd   :  { %v1264_v2 = vpop.eup %1263  ;;  %v732_v62 = vsub.f32 %v604_v11, %v695_v14  ;;  %v911_v32 = vadd.f32 %v910_v19, %v905_v47  ;;  %v925_v52 = vadd.f32 %v924_v12, %v923_v23  ;;  %v606_v60 = vmul.f32 2.0, %v574_v41 }
  0xde   :  { %v761_v39 = vadd.f32 %v760_v26, %v729_v22  ;;  %v576_v61 = vadd.f32 %v544_v10, %v512_v36  ;;  %v699_v34 = vmul.f32 0.6931472, %v1262_v29  ;;  %v733_v31 = vsub.f32 %v605_v40, %v697_v16 }
  0xdf   :  { %v1266_v37 = vpop.eup %1265  ;;  %v912_v33 = vsel %vm859_vm0, %v911_v32, 0.0  ;;  %v607_v27 = vmul.f32 2.0, %v575_v5  ;;  %v577_v44 = vadd.f32 %v545_v24, %v513_v35  ;;  %v701_v15 = vmul.f32 0.6931472, %v1264_v2 }
  0xe0   :  { %v762_v56 = vadd.f32 %v761_v39, %v730_v57  ;;  %913 = vadd.xlane.f32.xlu1 %v912_v33  ;;  %v926_v0 = vsel %vm859_vm0, %v925_v52, 0.0  ;;  %v608_v43 = vmul.f32 2.0, %v576_v61  ;;  %v703_v25 = vmul.f32 0.6931472, %v1266_v37 }
  0xe1   :  { %v1268_v46 = vpop.eup %1267  ;;  %v734_v17 = vsub.f32 %v606_v60, %v699_v34  ;;  %v609_v50 = vmul.f32 2.0, %v577_v44  ;;  %v735_v53 = vsub.f32 %v607_v27, %v701_v15  ;;  %v804_v8 = vmin.f32 %v803_v7, 20.0 }
  0xe2   :  { %v763_v3 = vadd.f32 %v762_v56, %v731_v13  ;;  %v705_v49 = vmul.f32 0.6931472, %v1268_v46  ;;  %v736_v30 = vsub.f32 %v608_v43, %v703_v25  ;;  %vm810_vm3 = vcmp.gt.f32.partialorder %v803_v7, 20.0 }
  0xe3   :  { %v805_v55 = vmul.f32 1.442695, %v804_v8  ;;  %v891_v63 = vmul.f32 %v2074_v4, %v2074_v4  ;;  %v814_v12 = vlaneseq  ;;  %vm950_vm5 = vcmask 0  }
  0xe4   :  { %v764_v58 = vadd.f32 %v763_v3, %v732_v62  ;;  %927 = vadd.xlane.f32.xlu1 %v926_v0  ;;  %v737_v45 = vsub.f32 %v609_v50, %v705_v49 }
  0xe5   :  { %1269 = vpow2.f32 %v805_v55  ;;  %v815_v16 = vshrl.u32 %v814_v12, 7 }
  0xe6   :  { %v765_v6 = vadd.f32 %v764_v58, %v733_v31 }
  0xe7   :  { %v2078_v39 = vsub.s32 0, %v815_v16 }
  0xe8   :  { %v766_v18 = vadd.f32 %v765_v6, %v734_v17 }
  0xe9   :  { %v817_v61 = vrot.slane %v1952_v48, %v2078_v39 }
  0xea   :  { %v767_v22 = vadd.f32 %v766_v18, %v735_v53 }
  0xec   :  { %v768_v59 = vadd.f32 %v767_v22, %v736_v30 }
  0xee   :  { %v769_v10 = vadd.f32 %v768_v59, %v737_v45 }
  0xef   :  { %v1270_v9 = vpop.eup %1269 }
  0xf0   :  { %938 = vadd.xlane.f32.xlu0 %v769_v10  ;;  %v807_v42 = vadd.f32 1.0, %v1270_v9 }
  0xf2   :  { %1271 = vlog2.f32 %v807_v42  ;;  %v831_v42 = vmul.f32 %v2005_v54, %v1965_v38 }
  0xfc   :  { %v1272_v28 = vpop.eup %1271 }
  0xfd   :  { %v809_v11 = vmul.f32 0.6931472, %v1272_v28 }
  0xff   :  { %v811_v1 = vsel %vm810_vm3, %v803_v7, %v809_v11 }
 0x100   :  { %v894_v51 = vadd.f32 1e-07, %v811_v1  ;;  %v890_v14 = vmul.f32 %v811_v1, %v811_v1  ;;  %v836_v1 = vrot.slane %v831_v42, %v2078_v39 }
 0x102   :  { %1273 = vlog2.f32 %v894_v51  ;;  %v892_v20 = vadd.f32 %v891_v63, %v890_v14 }
 0x104   :  { %v893_v29 = vmul.f32 2.0, %v892_v20 }
 0x10c   :  { %v1274_v23 = vpop.eup %1273 }
 0x10d   :  { %v896_v40 = vmul.f32 0.6931472, %v1274_v23 }
 0x10f   :  { %v897_v35 = vsub.f32 %v893_v29, %v896_v40 }
 0x111   :  { %v898_v52 = vadd.f32 -1.1931472, %v897_v35 }
 0x15d   :  { %v862_v21 = vpop.xlane.xlu0 %861 }
 0x15e   :  { %v863_v47 = vrot.slane %v862_v21, 4 }
 0x160   :  { %v864_v57 = vadd.f32 %v863_v47, %v862_v21 }
 0x161   :  { %v881_v41 = vpop.xlane.xlu0 %880 }
 0x162   :  { %v865_v36 = vrot.slane %v864_v57, 2  ;;  %v882_v26 = vrot.slane %v881_v41, 4 }
 0x164   :  { %v883_v24 = vadd.f32 %v882_v26, %v881_v41  ;;  %v866_v19 = vadd.f32 %v865_v36, %v864_v57 }
 0x166   :  { %v884_v13 = vrot.slane %v883_v24, 2  ;;  %v867_v5 = vrot.slane %v866_v19, 1 }
 0x168   :  { %v868_v2 = vadd.f32 %v867_v5, %v866_v19  ;;  %v885_v62 = vadd.f32 %v884_v13, %v883_v24 }
 0x16a   :  { %1039 = vpush %v868_v2  ;;  %v886_v32 = vrot.slane %v885_v62, 1 }
 0x16b   :  { %v1004_v60 = vpop.f32.mrb[0].mxu0 }
 0x16c   :  { %v887_v34 = vadd.f32 %v886_v32, %v885_v62  ;;  %v1005_v56 = vpop.f32.mrb[1].mxu0 }
 0x16d   :  { %v914_v37 = vpop.xlane.xlu1 %913  ;;  %v1006_v31 = vadd.f32 %v1005_v56, %v1004_v60 }
 0x16e   :  { %v915_v33 = vrot.slane %v914_v37, 4  ;;  %1041 = vpush %v887_v34 }
 0x16f   :  { %1043 = vpush %v898_v52  ;;  %v819_v27 = vadd.f32 %v1006_v31, %v817_v61 }
 0x170   :  { %v916_v44 = vadd.f32 %v915_v33, %v914_v37 }
 0x171   :  { %v928_v15 = vpop.xlane.xlu1 %927  ;;  %v820_v3 = vmul.f32 10.0, %v819_v27 }
 0x172   :  { %v917_v46 = vrot.slane %v916_v44, 2  ;;  %v929_v0 = vrot.slane %v928_v15, 4 }
 0x173   :  { %v821_v43 = vmin.f32 %v820_v3, 20.0  ;;  %vm829_vm4 = vcmp.gt.f32.partialorder %v820_v3, 20.0 }
 0x174   :  { %v930_v25 = vadd.f32 %v929_v0, %v928_v15  ;;  %v918_v17 = vadd.f32 %v917_v46, %v916_v44 }
 0x175   :  { %v822_v58 = vmul.f32 1.442695, %v821_v43 }
 0x176   :  { %v931_v50 = vrot.slane %v930_v25, 2  ;;  %v919_v49 = vrot.slane %v918_v17, 1 }
 0x177   :  { %1275 = vpow2.f32 %v822_v58 }
 0x178   :  { %v920_v48 = vadd.f32 %v919_v49, %v918_v17  ;;  %v932_v53 = vadd.f32 %v931_v50, %v930_v25 }
 0x17a   :  { %1045 = vpush %v920_v48  ;;  %v933_v6 = vrot.slane %v932_v53, 1 }
 0x17c   :  { %v934_v45 = vadd.f32 %v933_v6, %v932_v53 }
 0x17d   :  { %v939_v30 = vpop.xlane.xlu0 %938 }
 0x17e   :  { %v940_v18 = vrot.slane %v939_v30, 4  ;;  %1047 = vpush %v934_v45 }
 0x180   :  { %v941_v22 = vadd.f32 %v940_v18, %v939_v30 }
 0x181   :  { %v1276_v10 = vpop.eup %1275 }
 0x182   :  { %v942_v59 = vrot.slane %v941_v22, 2  ;;  %v824_v8 = vadd.f32 1.0, %v1276_v10 }
 0x184   :  { %v943_v7 = vadd.f32 %v942_v59, %v941_v22  ;;  %1277 = vlog2.f32 %v824_v8 }
 0x186   :  { %v944_v55 = vrot.slane %v943_v7, 1 }
 0x188   :  { %v945_v9 = vadd.f32 %v944_v55, %v943_v7 }
 0x18a   :  { %1049 = vpush %v945_v9 }
 0x18e   :  { %v1278_v28 = vpop.eup %1277 }
 0x18f   :  { %v826_v11 = vmul.f32 0.6931472, %v1278_v28 }
 0x191   :  { %v828_v51 = vmul.f32 0.1, %v826_v11 }
 0x193   :  { %v830_v14 = vsel %vm829_vm4, %v819_v27, %v828_v51 }
 0x194   :  { %v838_v63 = vmul.f32 %v836_v1, %v830_v14 }
 0x196   :  { %839 = vadd.xlane.f32.xlu1 %v838_v63 }
 0x19b   :  { %s1040_s5 = spop %1039 }
 0x19f   :  { %s1042_s20 = spop %1041 }
 0x1a0   :  { %s889_s21 = sadd.f32 %s1042_s20, %s1040_s5  ;;  %s1044_s23 = spop %1043 }
 0x1a2   :  { %s901_s24 = sadd.f32 %s1044_s23, %s889_s21 }
 0x1ab   :  { %s1046_s25 = spop %1045 }
 0x1ac   :  { %s922_s1 = sadd.f32 %s1046_s25, %s901_s24 }
 0x1af   :  { %s1048_s22 = spop %1047 }
 0x1b0   :  { %s936_s26 = ssub.f32 %s922_s1, %s1048_s22 }
 0x1b2   :  { %v948_v21 = vstv %s936_s26 }
 0x1bb   :  { %s1050_s28 = spop %1049 }
 0x1bc   :  { %v947_v38 = vstv %s1050_s28 }
 0x1bd   :  { %v949_v54 = vadd.f32 %v948_v21, %v947_v38 }
 0x1bf   :  { %951 = vst.msk [vmem:[#allocation12] sm:$0x1] %vm950_vm5, %v949_v54 }
 0x1c0   :  { %1356 = shalt.err (!%p1353_p0)
}
 0x1c1   :  { %s1357_s16 = scalar_lea.hbm %s2112_s11, 16 }
 0x1c2   :  { %p1358_p1 = scmp.ne.s32.totalorder %s2112_s11, %s1357_s16  ;;  %p1361_p2 = scmp.lt.u32.totalorder %s1357_s16, %s2112_s11 }
 0x1c4   :  { %p1363_p3 = pnand %p1361_p2, %p1358_p1 }
 0x1c6   :  { %1366 = shalt.err (!%p1363_p3)
}
 0x1c7   :  { %963 = dma.vmem_to_hbm [thread:$0]  %s961_s7, 16, %s2112_s11, [#allocation8]   ;;  %v845_v47 = vrot.slane %v2074_v4, %v2078_v39  ;;  %vm848_vm6 = vcmask 7168  }
 0x223   :  { %v840_v20 = vpop.xlane.xlu1 %839 }
 0x224   :  { %v847_v23 = vadd.f32 %v845_v47, %v840_v20 }
 0x226   :  { %849 = vst.msk [vmem:[%s2111_s10] sm:$0xff] %vm848_vm6, %v847_v23 }
 0x227   :  { %1371 = dma.done.wait [#allocation8], 16  }
 0x228   :  { %1372 = vsyncadd [#allocation8], 4294967280 }
 0x229   :  { %969 = vsyncpa [#allocation7], 1 }
 0x22a   :  { %970 = vsyncpa [#allocation10], 1 }
 0x22b   :  { %971 = vsyncpa [#allocation8], 1 }

</bundles_post_ra>
